<compile_context>
chip_gen: v6e
topology: v6e:2x2x1
jax: 0.10.0
libtpu: 0.0.40
codegen_flags: <defaults>
</compile_context>

<pallas_src>
import math

import jax
import jax.numpy as jnp
from jax import lax
from jax.experimental import pallas as pl
from jax.experimental.pallas import tpu as pltpu

N_HEAD = 4
D_K = 32
LN_EPS = 1e-5


def mha_kernel(q_ref, k_ref, v_ref, wq_ref, wk_ref, wv_ref, wo_ref,
               gamma_ref, beta_ref, o_ref):
    """Fused MHA + residual + LayerNorm for one batch element.

    q_ref/k_ref/v_ref : (L, D)      input sequences (batch dim squeezed out)
    wq/wk/wv          : (D, H*dk)   projection weights, "x @ W" layout
    wo                : (H*dk, D)   output projection ("x @ W" layout)
    gamma/beta        : (1, D)      LayerNorm affine parameters
    o_ref             : (L, D)      output
    """
    x_q = q_ref[...]
    x_k = k_ref[...]
    x_v = v_ref[...]

    # QKV projections on the MXU, f32 accumulation.
    q = jnp.dot(x_q, wq_ref[...], preferred_element_type=jnp.float32)  # (L, H*dk)
    k = jnp.dot(x_k, wk_ref[...], preferred_element_type=jnp.float32)
    v = jnp.dot(x_v, wv_ref[...], preferred_element_type=jnp.float32)

    scale = 1.0 / math.sqrt(D_K)
    ctx = []
    # Statically unrolled loop over the 4 heads; each head is a contiguous
    # 32-lane slice of the projected activations (no relayout needed).
    for h in range(N_HEAD):
        sl = slice(h * D_K, (h + 1) * D_K)
        qh, kh, vh = q[:, sl], k[:, sl], v[:, sl]
        # scores = qh @ kh^T : contract the dk axis of both operands
        # (no explicit transpose materialised).
        s = lax.dot_general(qh, kh, (((1,), (1,)), ((), ())),
                            preferred_element_type=jnp.float32) * scale     # (L, L)
        # Numerically stable softmax over the key axis; the normalisation is
        # deferred past the attn @ V matmul so the reciprocal (EUP) overlaps
        # with the matmul (MXU) and scales (L, dk) instead of (L, L).
        m = jnp.max(s, axis=-1, keepdims=True)
        p = jnp.exp(s - m)
        inv_denom = 1.0 / jnp.sum(p, axis=-1, keepdims=True)                # (L, 1)
        ctx_h = jnp.dot(p, vh, preferred_element_type=jnp.float32)          # (L, dk)
        ctx.append(ctx_h * inv_denom)

    context = jnp.concatenate(ctx, axis=-1)                                  # (L, H*dk)
    out = jnp.dot(context, wo_ref[...], preferred_element_type=jnp.float32)  # (L, D)

    # Residual + LayerNorm (single-pass stats: sum and sum-of-squares).
    y = out + x_q
    d = y.shape[-1]
    s1 = jnp.sum(y, axis=-1, keepdims=True)
    s2 = jnp.sum(y * y, axis=-1, keepdims=True)
    mean = s1 / d
    var = s2 / d - mean * mean
    inv = lax.rsqrt(var + LN_EPS)
    o_ref[...] = (y - mean) * inv * gamma_ref[...] + beta_ref[...]


def multi_head_attention(input_q, input_k, input_v, wq, wk, wv, wo, gamma, beta):
    """input_*: (B, L, D); wq/wk/wv: (D, H*dk); wo: (H*dk, D); gamma/beta: (1, D)."""
    B, L, D = input_q.shape
    HD = N_HEAD * D_K

    flops = B * (3 * 2 * L * D * HD        # QKV projections
                 + 2 * 2 * L * L * HD       # scores + attn@V over all heads
                 + 2 * L * HD * D)          # output projection
    transcendentals = B * (N_HEAD * (L * L + L) + L)   # exp + recip + rsqrt
    bytes_accessed = (4 * B * L * D + 3 * D * HD + HD * D + 2 * D) * 4

    seq_spec = pl.BlockSpec((None, L, D), lambda b: (b, 0, 0))
    proj_spec = pl.BlockSpec((D, HD), lambda b: (0, 0))

    return pl.pallas_call(
        mha_kernel,
        out_shape=jax.ShapeDtypeStruct((B, L, D), jnp.float32),
        grid=(B,),
        in_specs=[
            seq_spec, seq_spec, seq_spec,              # input_Q, input_K, input_V
            proj_spec, proj_spec, proj_spec,           # W_Q, W_K, W_V
            pl.BlockSpec((HD, D), lambda b: (0, 0)),   # fc
            pl.BlockSpec((1, D), lambda b: (0, 0)),    # LayerNorm gamma
            pl.BlockSpec((1, D), lambda b: (0, 0)),    # LayerNorm beta
        ],
        out_specs=seq_spec,
        compiler_params=pltpu.CompilerParams(
            dimension_semantics=("parallel",),
            vmem_limit_bytes=32 * 1024 * 1024),
        cost_estimate=pl.CostEstimate(flops=flops,
                                      transcendentals=transcendentals,
                                      bytes_accessed=bytes_accessed),
    )(input_q, input_k, input_v, wq, wk, wv, wo, gamma, beta)


def reference_forward(input_q, input_k, input_v, wq, wk, wv, wo, gamma, beta):
    """Pure-JAX reference matching the PyTorch MultiHeadAttention forward."""
    B, L, D = input_q.shape
    q = (input_q @ wq).reshape(B, L, N_HEAD, D_K).transpose(0, 2, 1, 3)
    k = (input_k @ wk).reshape(B, L, N_HEAD, D_K).transpose(0, 2, 1, 3)
    v = (input_v @ wv).reshape(B, L, N_HEAD, D_K).transpose(0, 2, 1, 3)
    scores = jnp.einsum("bhqd,bhkd->bhqk", q, k) / jnp.sqrt(jnp.float32(D_K))
    attn = jax.nn.softmax(scores, axis=-1)
    context = jnp.einsum("bhqk,bhkd->bhqd", attn, v)
    context = context.transpose(0, 2, 1, 3).reshape(B, L, N_HEAD * D_K)
    out = context @ wo + input_q
    mean = jnp.mean(out, axis=-1, keepdims=True)
    var = jnp.mean((out - mean) ** 2, axis=-1, keepdims=True)
    return (out - mean) * lax.rsqrt(var + LN_EPS) * gamma + beta


if __name__ == "__main__":
    # MultiHeadAttention(d_model=128): n_head*dk = 128 == d_model, everything
    # lane-aligned.  Small shapes: batch=2, seq=16.
    B, L, D = 2, 16, 128
    HD = N_HEAD * D_K

    key = jax.random.PRNGKey(0)
    kq, kk, kv, k1, k2, k3, k4 = jax.random.split(key, 7)
    input_q = jax.random.normal(kq, (B, L, D), dtype=jnp.float32)
    input_k = jax.random.normal(kk, (B, L, D), dtype=jnp.float32)
    input_v = jax.random.normal(kv, (B, L, D), dtype=jnp.float32)

    # Deterministic synthetic parameters (nn.Linear bias=False; "x @ W" layout).
    bound = 1.0 / math.sqrt(D)
    wq = jax.random.uniform(k1, (D, HD), minval=-bound, maxval=bound, dtype=jnp.float32)
    wk = jax.random.uniform(k2, (D, HD), minval=-bound, maxval=bound, dtype=jnp.float32)
    wv = jax.random.uniform(k3, (D, HD), minval=-bound, maxval=bound, dtype=jnp.float32)
    bound_o = 1.0 / math.sqrt(HD)
    wo = jax.random.uniform(k4, (HD, D), minval=-bound_o, maxval=bound_o, dtype=jnp.float32)
    gamma = jnp.ones((1, D), dtype=jnp.float32)    # nn.LayerNorm default affine init
    beta = jnp.zeros((1, D), dtype=jnp.float32)

    out = multi_head_attention(input_q, input_k, input_v, wq, wk, wv, wo, gamma, beta)
    out = jax.block_until_ready(out)

    ref = reference_forward(input_q, input_k, input_v, wq, wk, wv, wo, gamma, beta)
    assert out.shape == (B, L, D)
    assert jnp.allclose(out, ref, atol=2e-4, rtol=2e-4), "mismatch vs reference"

    print("KERNEL_OK")
</pallas_src>

<mosaic_0001>
module attributes {stable_mosaic.version = 11 : i64} {
  func.func @mha_kernel(%arg0: i32, %arg1: memref<1x16x128xf32, #tpu.memory_space<vmem>>, %arg2: memref<1x16x128xf32, #tpu.memory_space<vmem>>, %arg3: memref<1x16x128xf32, #tpu.memory_space<vmem>>, %arg4: memref<128x128xf32, #tpu.memory_space<vmem>>, %arg5: memref<128x128xf32, #tpu.memory_space<vmem>>, %arg6: memref<128x128xf32, #tpu.memory_space<vmem>>, %arg7: memref<128x128xf32, #tpu.memory_space<vmem>>, %arg8: memref<1x128xf32, #tpu.memory_space<vmem>>, %arg9: memref<1x128xf32, #tpu.memory_space<vmem>>, %arg10: memref<1x16x128xf32, #tpu.memory_space<vmem>>) attributes {dimension_semantics = [#tpu.dimension_semantics<parallel>], iteration_bounds = array<i64: 2>, scalar_prefetch = 0 : i64, scratch_operands = 0 : i64, tpu.core_type = #tpu.core_type<tc>, window_params = [{transform_indices = @transform_0, window_bounds = array<i64: 1, 16, 128>}, {transform_indices = @transform_1, window_bounds = array<i64: 1, 16, 128>}, {transform_indices = @transform_2, window_bounds = array<i64: 1, 16, 128>}, {pipeline_mode = #tpu.pipeline_mode<synchronous>, transform_indices = @transform_3, window_bounds = array<i64: 128, 128>}, {pipeline_mode = #tpu.pipeline_mode<synchronous>, transform_indices = @transform_4, window_bounds = array<i64: 128, 128>}, {pipeline_mode = #tpu.pipeline_mode<synchronous>, transform_indices = @transform_5, window_bounds = array<i64: 128, 128>}, {pipeline_mode = #tpu.pipeline_mode<synchronous>, transform_indices = @transform_6, window_bounds = array<i64: 128, 128>}, {pipeline_mode = #tpu.pipeline_mode<synchronous>, transform_indices = @transform_7, window_bounds = array<i64: 1, 128>}, {pipeline_mode = #tpu.pipeline_mode<synchronous>, transform_indices = @transform_8, window_bounds = array<i64: 1, 128>}, {transform_indices = @transform_9, window_bounds = array<i64: 1, 16, 128>}]} {
    %c0 = arith.constant 0 : index
    %c0_0 = arith.constant 0 : index
    %c0_1 = arith.constant 0 : index
    %0 = vector.load %arg1[%c0, %c0_0, %c0_1] : memref<1x16x128xf32, #tpu.memory_space<vmem>>, vector<1x16x128xf32>
    %1 = vector.shape_cast %0 : vector<1x16x128xf32> to vector<16x128xf32>
    %c0_2 = arith.constant 0 : index
    %c0_3 = arith.constant 0 : index
    %c0_4 = arith.constant 0 : index
    %2 = vector.load %arg2[%c0_2, %c0_3, %c0_4] : memref<1x16x128xf32, #tpu.memory_space<vmem>>, vector<1x16x128xf32>
    %3 = vector.shape_cast %2 : vector<1x16x128xf32> to vector<16x128xf32>
    %c0_5 = arith.constant 0 : index
    %c0_6 = arith.constant 0 : index
    %c0_7 = arith.constant 0 : index
    %4 = vector.load %arg3[%c0_5, %c0_6, %c0_7] : memref<1x16x128xf32, #tpu.memory_space<vmem>>, vector<1x16x128xf32>
    %5 = vector.shape_cast %4 : vector<1x16x128xf32> to vector<16x128xf32>
    %c0_8 = arith.constant 0 : index
    %c0_9 = arith.constant 0 : index
    %6 = vector.load %arg4[%c0_8, %c0_9] : memref<128x128xf32, #tpu.memory_space<vmem>>, vector<128x128xf32>
    %cst = arith.constant dense<0.000000e+00> : vector<16x128xf32>
    %7 = tpu.matmul %1, %6, %cst {dimension_numbers = #tpu.dot_dimension_numbers<[1], [0], [0], [1], [0, 0, 1, 1], [], []>} : vector<16x128xf32>, vector<128x128xf32>, vector<16x128xf32> -> vector<16x128xf32>
    %c0_10 = arith.constant 0 : index
    %c0_11 = arith.constant 0 : index
    %8 = vector.load %arg5[%c0_10, %c0_11] : memref<128x128xf32, #tpu.memory_space<vmem>>, vector<128x128xf32>
    %cst_12 = arith.constant dense<0.000000e+00> : vector<16x128xf32>
    %9 = tpu.matmul %3, %8, %cst_12 {dimension_numbers = #tpu.dot_dimension_numbers<[1], [0], [0], [1], [0, 0, 1, 1], [], []>} : vector<16x128xf32>, vector<128x128xf32>, vector<16x128xf32> -> vector<16x128xf32>
    %c0_13 = arith.constant 0 : index
    %c0_14 = arith.constant 0 : index
    %10 = vector.load %arg6[%c0_13, %c0_14] : memref<128x128xf32, #tpu.memory_space<vmem>>, vector<128x128xf32>
    %cst_15 = arith.constant dense<0.000000e+00> : vector<16x128xf32>
    %11 = tpu.matmul %5, %10, %cst_15 {dimension_numbers = #tpu.dot_dimension_numbers<[1], [0], [0], [1], [0, 0, 1, 1], [], []>} : vector<16x128xf32>, vector<128x128xf32>, vector<16x128xf32> -> vector<16x128xf32>
    %12 = vector.extract_strided_slice %7 {offsets = [0, 0], sizes = [16, 32], strides = [1, 1]} : vector<16x128xf32> to vector<16x32xf32>
    %13 = vector.extract_strided_slice %9 {offsets = [0, 0], sizes = [16, 32], strides = [1, 1]} : vector<16x128xf32> to vector<16x32xf32>
    %14 = vector.extract_strided_slice %11 {offsets = [0, 0], sizes = [16, 32], strides = [1, 1]} : vector<16x128xf32> to vector<16x32xf32>
    %cst_16 = arith.constant dense<0.000000e+00> : vector<16x16xf32>
    %15 = tpu.matmul %12, %13, %cst_16 {dimension_numbers = #tpu.dot_dimension_numbers<[1], [1], [0], [0], [0, 0, 1, 0], [], []>} : vector<16x32xf32>, vector<16x32xf32>, vector<16x16xf32> -> vector<16x16xf32>
    %cst_17 = arith.constant 0.176776692 : f32
    %16 = vector.broadcast %cst_17 : f32 to vector<16x16xf32>
    %17 = arith.mulf %15, %16 : vector<16x16xf32>
    %cst_18 = arith.constant dense<0xFF800000> : vector<16xf32>
    %18 = vector.multi_reduction <maximumf>, %17, %cst_18 [1] : vector<16x16xf32> to vector<16xf32>
    %19 = vector.shape_cast %18 : vector<16xf32> to vector<16x1xf32>
    %20 = vector.broadcast %19 : vector<16x1xf32> to vector<16x16xf32>
    %21 = arith.subf %17, %20 : vector<16x16xf32>
    %22 = math.exp %21 : vector<16x16xf32>
    %cst_19 = arith.constant dense<0.000000e+00> : vector<16xf32>
    %23 = vector.multi_reduction <add>, %22, %cst_19 [1] : vector<16x16xf32> to vector<16xf32>
    %24 = vector.shape_cast %23 : vector<16xf32> to vector<16x1xf32>
    %cst_20 = arith.constant 1.000000e+00 : f32
    %25 = vector.broadcast %cst_20 : f32 to vector<16x1xf32>
    %26 = arith.divf %25, %24 : vector<16x1xf32>
    %cst_21 = arith.constant dense<0.000000e+00> : vector<16x32xf32>
    %27 = tpu.matmul %22, %14, %cst_21 {dimension_numbers = #tpu.dot_dimension_numbers<[1], [0], [0], [1], [0, 0, 1, 1], [], []>} : vector<16x16xf32>, vector<16x32xf32>, vector<16x32xf32> -> vector<16x32xf32>
    %28 = vector.broadcast %26 : vector<16x1xf32> to vector<16x32xf32>
    %29 = arith.mulf %27, %28 : vector<16x32xf32>
    %30 = vector.extract_strided_slice %7 {offsets = [0, 32], sizes = [16, 32], strides = [1, 1]} : vector<16x128xf32> to vector<16x32xf32>
    %31 = vector.extract_strided_slice %9 {offsets = [0, 32], sizes = [16, 32], strides = [1, 1]} : vector<16x128xf32> to vector<16x32xf32>
    %32 = vector.extract_strided_slice %11 {offsets = [0, 32], sizes = [16, 32], strides = [1, 1]} : vector<16x128xf32> to vector<16x32xf32>
    %cst_22 = arith.constant dense<0.000000e+00> : vector<16x16xf32>
    %33 = tpu.matmul %30, %31, %cst_22 {dimension_numbers = #tpu.dot_dimension_numbers<[1], [1], [0], [0], [0, 0, 1, 0], [], []>} : vector<16x32xf32>, vector<16x32xf32>, vector<16x16xf32> -> vector<16x16xf32>
    %cst_23 = arith.constant 0.176776692 : f32
    %34 = vector.broadcast %cst_23 : f32 to vector<16x16xf32>
    %35 = arith.mulf %33, %34 : vector<16x16xf32>
    %cst_24 = arith.constant dense<0xFF800000> : vector<16xf32>
    %36 = vector.multi_reduction <maximumf>, %35, %cst_24 [1] : vector<16x16xf32> to vector<16xf32>
    %37 = vector.shape_cast %36 : vector<16xf32> to vector<16x1xf32>
    %38 = vector.broadcast %37 : vector<16x1xf32> to vector<16x16xf32>
    %39 = arith.subf %35, %38 : vector<16x16xf32>
    %40 = math.exp %39 : vector<16x16xf32>
    %cst_25 = arith.constant dense<0.000000e+00> : vector<16xf32>
    %41 = vector.multi_reduction <add>, %40, %cst_25 [1] : vector<16x16xf32> to vector<16xf32>
    %42 = vector.shape_cast %41 : vector<16xf32> to vector<16x1xf32>
    %cst_26 = arith.constant 1.000000e+00 : f32
    %43 = vector.broadcast %cst_26 : f32 to vector<16x1xf32>
    %44 = arith.divf %43, %42 : vector<16x1xf32>
    %cst_27 = arith.constant dense<0.000000e+00> : vector<16x32xf32>
    %45 = tpu.matmul %40, %32, %cst_27 {dimension_numbers = #tpu.dot_dimension_numbers<[1], [0], [0], [1], [0, 0, 1, 1], [], []>} : vector<16x16xf32>, vector<16x32xf32>, vector<16x32xf32> -> vector<16x32xf32>
    %46 = vector.broadcast %44 : vector<16x1xf32> to vector<16x32xf32>
    %47 = arith.mulf %45, %46 : vector<16x32xf32>
    %48 = vector.extract_strided_slice %7 {offsets = [0, 64], sizes = [16, 32], strides = [1, 1]} : vector<16x128xf32> to vector<16x32xf32>
    %49 = vector.extract_strided_slice %9 {offsets = [0, 64], sizes = [16, 32], strides = [1, 1]} : vector<16x128xf32> to vector<16x32xf32>
    %50 = vector.extract_strided_slice %11 {offsets = [0, 64], sizes = [16, 32], strides = [1, 1]} : vector<16x128xf32> to vector<16x32xf32>
    %cst_28 = arith.constant dense<0.000000e+00> : vector<16x16xf32>
    %51 = tpu.matmul %48, %49, %cst_28 {dimension_numbers = #tpu.dot_dimension_numbers<[1], [1], [0], [0], [0, 0, 1, 0], [], []>} : vector<16x32xf32>, vector<16x32xf32>, vector<16x16xf32> -> vector<16x16xf32>
    %cst_29 = arith.constant 0.176776692 : f32
    %52 = vector.broadcast %cst_29 : f32 to vector<16x16xf32>
    %53 = arith.mulf %51, %52 : vector<16x16xf32>
    %cst_30 = arith.constant dense<0xFF800000> : vector<16xf32>
    %54 = vector.multi_reduction <maximumf>, %53, %cst_30 [1] : vector<16x16xf32> to vector<16xf32>
    %55 = vector.shape_cast %54 : vector<16xf32> to vector<16x1xf32>
    %56 = vector.broadcast %55 : vector<16x1xf32> to vector<16x16xf32>
    %57 = arith.subf %53, %56 : vector<16x16xf32>
    %58 = math.exp %57 : vector<16x16xf32>
    %cst_31 = arith.constant dense<0.000000e+00> : vector<16xf32>
    %59 = vector.multi_reduction <add>, %58, %cst_31 [1] : vector<16x16xf32> to vector<16xf32>
    %60 = vector.shape_cast %59 : vector<16xf32> to vector<16x1xf32>
    %cst_32 = arith.constant 1.000000e+00 : f32
    %61 = vector.broadcast %cst_32 : f32 to vector<16x1xf32>
    %62 = arith.divf %61, %60 : vector<16x1xf32>
    %cst_33 = arith.constant dense<0.000000e+00> : vector<16x32xf32>
    %63 = tpu.matmul %58, %50, %cst_33 {dimension_numbers = #tpu.dot_dimension_numbers<[1], [0], [0], [1], [0, 0, 1, 1], [], []>} : vector<16x16xf32>, vector<16x32xf32>, vector<16x32xf32> -> vector<16x32xf32>
    %64 = vector.broadcast %62 : vector<16x1xf32> to vector<16x32xf32>
    %65 = arith.mulf %63, %64 : vector<16x32xf32>
    %66 = vector.extract_strided_slice %7 {offsets = [0, 96], sizes = [16, 32], strides = [1, 1]} : vector<16x128xf32> to vector<16x32xf32>
    %67 = vector.extract_strided_slice %9 {offsets = [0, 96], sizes = [16, 32], strides = [1, 1]} : vector<16x128xf32> to vector<16x32xf32>
    %68 = vector.extract_strided_slice %11 {offsets = [0, 96], sizes = [16, 32], strides = [1, 1]} : vector<16x128xf32> to vector<16x32xf32>
    %cst_34 = arith.constant dense<0.000000e+00> : vector<16x16xf32>
    %69 = tpu.matmul %66, %67, %cst_34 {dimension_numbers = #tpu.dot_dimension_numbers<[1], [1], [0], [0], [0, 0, 1, 0], [], []>} : vector<16x32xf32>, vector<16x32xf32>, vector<16x16xf32> -> vector<16x16xf32>
    %cst_35 = arith.constant 0.176776692 : f32
    %70 = vector.broadcast %cst_35 : f32 to vector<16x16xf32>
    %71 = arith.mulf %69, %70 : vector<16x16xf32>
    %cst_36 = arith.constant dense<0xFF800000> : vector<16xf32>
    %72 = vector.multi_reduction <maximumf>, %71, %cst_36 [1] : vector<16x16xf32> to vector<16xf32>
    %73 = vector.shape_cast %72 : vector<16xf32> to vector<16x1xf32>
    %74 = vector.broadcast %73 : vector<16x1xf32> to vector<16x16xf32>
    %75 = arith.subf %71, %74 : vector<16x16xf32>
    %76 = math.exp %75 : vector<16x16xf32>
    %cst_37 = arith.constant dense<0.000000e+00> : vector<16xf32>
    %77 = vector.multi_reduction <add>, %76, %cst_37 [1] : vector<16x16xf32> to vector<16xf32>
    %78 = vector.shape_cast %77 : vector<16xf32> to vector<16x1xf32>
    %cst_38 = arith.constant 1.000000e+00 : f32
    %79 = vector.broadcast %cst_38 : f32 to vector<16x1xf32>
    %80 = arith.divf %79, %78 : vector<16x1xf32>
    %cst_39 = arith.constant dense<0.000000e+00> : vector<16x32xf32>
    %81 = tpu.matmul %76, %68, %cst_39 {dimension_numbers = #tpu.dot_dimension_numbers<[1], [0], [0], [1], [0, 0, 1, 1], [], []>} : vector<16x16xf32>, vector<16x32xf32>, vector<16x32xf32> -> vector<16x32xf32>
    %82 = vector.broadcast %80 : vector<16x1xf32> to vector<16x32xf32>
    %83 = arith.mulf %81, %82 : vector<16x32xf32>
    %84 = tpu.concatenate %29, %47, %65, %83 in 1 : vector<16x32xf32>, vector<16x32xf32>, vector<16x32xf32>, vector<16x32xf32> -> vector<16x128xf32>
    %c0_40 = arith.constant 0 : index
    %c0_41 = arith.constant 0 : index
    %85 = vector.load %arg7[%c0_40, %c0_41] : memref<128x128xf32, #tpu.memory_space<vmem>>, vector<128x128xf32>
    %cst_42 = arith.constant dense<0.000000e+00> : vector<16x128xf32>
    %86 = tpu.matmul %84, %85, %cst_42 {dimension_numbers = #tpu.dot_dimension_numbers<[1], [0], [0], [1], [0, 0, 1, 1], [], []>} : vector<16x128xf32>, vector<128x128xf32>, vector<16x128xf32> -> vector<16x128xf32>
    %87 = arith.addf %86, %1 : vector<16x128xf32>
    %cst_43 = arith.constant dense<0.000000e+00> : vector<16xf32>
    %88 = vector.multi_reduction <add>, %87, %cst_43 [1] : vector<16x128xf32> to vector<16xf32>
    %89 = vector.shape_cast %88 : vector<16xf32> to vector<16x1xf32>
    %90 = arith.mulf %87, %87 : vector<16x128xf32>
    %cst_44 = arith.constant dense<0.000000e+00> : vector<16xf32>
    %91 = vector.multi_reduction <add>, %90, %cst_44 [1] : vector<16x128xf32> to vector<16xf32>
    %92 = vector.shape_cast %91 : vector<16xf32> to vector<16x1xf32>
    %cst_45 = arith.constant 1.280000e+02 : f32
    %93 = vector.broadcast %cst_45 : f32 to vector<16x1xf32>
    %94 = arith.divf %89, %93 : vector<16x1xf32>
    %cst_46 = arith.constant 1.280000e+02 : f32
    %95 = vector.broadcast %cst_46 : f32 to vector<16x1xf32>
    %96 = arith.divf %92, %95 : vector<16x1xf32>
    %97 = arith.mulf %94, %94 : vector<16x1xf32>
    %98 = arith.subf %96, %97 : vector<16x1xf32>
    %cst_47 = arith.constant 9.99999974E-6 : f32
    %99 = vector.broadcast %cst_47 : f32 to vector<16x1xf32>
    %100 = arith.addf %98, %99 : vector<16x1xf32>
    %101 = math.rsqrt %100 : vector<16x1xf32>
    %102 = vector.broadcast %94 : vector<16x1xf32> to vector<16x128xf32>
    %103 = arith.subf %87, %102 : vector<16x128xf32>
    %104 = vector.broadcast %101 : vector<16x1xf32> to vector<16x128xf32>
    %105 = arith.mulf %103, %104 : vector<16x128xf32>
    %c0_48 = arith.constant 0 : index
    %c0_49 = arith.constant 0 : index
    %106 = vector.load %arg8[%c0_48, %c0_49] : memref<1x128xf32, #tpu.memory_space<vmem>>, vector<1x128xf32>
    %107 = vector.broadcast %106 : vector<1x128xf32> to vector<16x128xf32>
    %108 = arith.mulf %105, %107 : vector<16x128xf32>
    %c0_50 = arith.constant 0 : index
    %c0_51 = arith.constant 0 : index
    %109 = vector.load %arg9[%c0_50, %c0_51] : memref<1x128xf32, #tpu.memory_space<vmem>>, vector<1x128xf32>
    %110 = vector.broadcast %109 : vector<1x128xf32> to vector<16x128xf32>
    %111 = arith.addf %108, %110 : vector<16x128xf32>
    %c0_52 = arith.constant 0 : index
    %c0_53 = arith.constant 0 : index
    %c0_54 = arith.constant 0 : index
    %112 = vector.load %arg10[%c0_52, %c0_53, %c0_54] : memref<1x16x128xf32, #tpu.memory_space<vmem>>, vector<1x16x128xf32>
    %113 = vector.shape_cast %112 : vector<1x16x128xf32> to vector<16x128xf32>
    %114 = vector.shape_cast %111 : vector<16x128xf32> to vector<1x16x128xf32>
    tpu.vector_store %arg10[%c0_52, %c0_53, %c0_54], %114 {strides = array<i32>} : memref<1x16x128xf32, #tpu.memory_space<vmem>>, vector<1x16x128xf32>,
    return
  }
  func.func @transform_0(%arg0: i32) -> (i32, i32, i32) {
    %c0_i32 = arith.constant 0 : i32
    %c0_i32_0 = arith.constant 0 : i32
    %c0_i32_1 = arith.constant 0 : i32
    return %arg0, %c0_i32, %c0_i32_0 : i32, i32, i32
  }
  func.func @transform_1(%arg0: i32) -> (i32, i32, i32) {
    %c0_i32 = arith.constant 0 : i32
    %c0_i32_0 = arith.constant 0 : i32
    %c0_i32_1 = arith.constant 0 : i32
    return %arg0, %c0_i32, %c0_i32_0 : i32, i32, i32
  }
  func.func @transform_2(%arg0: i32) -> (i32, i32, i32) {
    %c0_i32 = arith.constant 0 : i32
    %c0_i32_0 = arith.constant 0 : i32
    %c0_i32_1 = arith.constant 0 : i32
    return %arg0, %c0_i32, %c0_i32_0 : i32, i32, i32
  }
  func.func @transform_3(%arg0: i32) -> (i32, i32) {
    %c0_i32 = arith.constant 0 : i32
    %c0_i32_0 = arith.constant 0 : i32
    %c0_i32_1 = arith.constant 0 : i32
    return %c0_i32, %c0_i32_0 : i32, i32
  }
  func.func @transform_4(%arg0: i32) -> (i32, i32) {
    %c0_i32 = arith.constant 0 : i32
    %c0_i32_0 = arith.constant 0 : i32
    %c0_i32_1 = arith.constant 0 : i32
    return %c0_i32, %c0_i32_0 : i32, i32
  }
  func.func @transform_5(%arg0: i32) -> (i32, i32) {
    %c0_i32 = arith.constant 0 : i32
    %c0_i32_0 = arith.constant 0 : i32
    %c0_i32_1 = arith.constant 0 : i32
    return %c0_i32, %c0_i32_0 : i32, i32
  }
  func.func @transform_6(%arg0: i32) -> (i32, i32) {
    %c0_i32 = arith.constant 0 : i32
    %c0_i32_0 = arith.constant 0 : i32
    %c0_i32_1 = arith.constant 0 : i32
    return %c0_i32, %c0_i32_0 : i32, i32
  }
  func.func @transform_7(%arg0: i32) -> (i32, i32) {
    %c0_i32 = arith.constant 0 : i32
    %c0_i32_0 = arith.constant 0 : i32
    %c0_i32_1 = arith.constant 0 : i32
    return %c0_i32, %c0_i32_0 : i32, i32
  }
  func.func @transform_8(%arg0: i32) -> (i32, i32) {
    %c0_i32 = arith.constant 0 : i32
    %c0_i32_0 = arith.constant 0 : i32
    %c0_i32_1 = arith.constant 0 : i32
    return %c0_i32, %c0_i32_0 : i32, i32
  }
  func.func @transform_9(%arg0: i32) -> (i32, i32, i32) {
    %c0_i32 = arith.constant 0 : i32
    %c0_i32_0 = arith.constant 0 : i32
    %c0_i32_1 = arith.constant 0 : i32
    return %arg0, %c0_i32, %c0_i32_0 : i32, i32, i32
  }
}

</mosaic_0001>

<bundles_post_ra>
// kernel: tpu_custom_call.1
= control target key start
LH: loop header
LB: loop body
LE: loop exit
PB: predicated region body
PF: predicated region fallthrough
CT: control target
= control target key end

     0   :  { %s3238_s0 = inlined_call_operand.hbm [shape: f32[2,16,128], index: 0, kind: input, shape index: {}]   ;;  %s3239_s1 = inlined_call_operand.hbm [shape: f32[2,16,128], index: 1, kind: input, shape index: {}]   ;;  %s3240_s2 = inlined_call_operand.hbm [shape: f32[2,16,128], index: 2, kind: input, shape index: {}]   ;;  %s3241_s3 = inlined_call_operand.hbm [shape: f32[128,128], index: 3, kind: input, shape index: {}]   ;;  %s3242_s4 = inlined_call_operand.hbm [shape: f32[128,128], index: 4, kind: input, shape index: {}]   ;;  %s3243_s5 = inlined_call_operand.hbm [shape: f32[128,128], index: 5, kind: input, shape index: {}]   ;;  %s3244_s6 = inlined_call_operand.hbm [shape: f32[128,128], index: 6, kind: input, shape index: {}]   ;;  %s3245_s7 = inlined_call_operand.vmem [shape: f32[1,128], index: 7, kind: input, shape index: {}]   ;;  %s3246_s8 = inlined_call_operand.vmem [shape: f32[1,128], index: 8, kind: input, shape index: {}]   ;;  %s3247_s9 = inlined_call_operand.hbm [shape: f32[2,16,128], index: 9, kind: output, shape index: {}]  }
   0x1   :  { %3265 = sst [smem:[#allocation25_spill]] %s3239_s1 }
   0x2   :  { %3266 = sst [smem:[#allocation26_spill]] %s3241_s3 }
   0x3   :  { %3267 = sst [smem:[#allocation27_spill]] %s3243_s5 }
   0x4   :  { %14 = vsyncpa [#allocation3], 0 }
   0x5   :  { %16 = vsyncpa [#allocation3 + $0x1], 0 }
   0x6   :  { %17 = vsyncpa [#allocation6], 0 }
   0x7   :  { %19 = vsyncpa [#allocation6 + $0x1], 0 }
   0x8   :  { %20 = vsyncpa [#allocation9], 0 }
   0x9   :  { %21 = vsyncpa [#allocation12], 0 }
   0xa   :  { %22 = vsyncpa [#allocation4], 0 }
   0xb   :  { %24 = vsyncpa [#allocation4 + $0x1], 0  ;;  %s2759_s30 = smov 0   ;;  %s2761_s10 = smov 0  }
   0xc   :  { %s2763_s11 = smov 0   ;;  %s2765_s12 = smov 0  }
   0xd LB: > { %3268 = sst [smem:[#allocation20_spill]] %s2680_s30  ;;  %s2780_s13 = sadd.s32 4294967295, %s2692_s12   ;;  %s2692_s12 = sphi %s2765_s12, %s3301_s12   ;;  %s2688_s11 = sphi %s2763_s11, %s3305_s11   ;;  %s2684_s10 = sphi %s2761_s10, %s3304_s10   ;;  %s2680_s30 = sphi %s2759_s30, %s3303_s30  }
   0xe   : > { %3269 = sst [smem:[#allocation21_spill]] %s2692_s12  ;;  %s1913_s14 = sadd.s32 4294967294, %s2692_s12  }
   0xf   : > { %p50_p0 = scmp.ne.s32.totalorder %s2684_s10, %s2680_s30  ;;  %p3257_p1 = scmp.eq.s32.totalorder %s2780_s13, 0 }
  0x10   : > { %p252_p2 = scmp.eq.s32.totalorder %s2780_s13, 1  ;;  %p258_p3 = scmp.eq.s32.totalorder %s1913_s14, 1 }
  0x11   : > { %p2789_p4 = por %p3257_p1, %p50_p0  ;;  %p1914_p5 = scmp.ge.s32.totalorder %s2692_s12, 1 }
  0x12   : > { %p2794_p6 = por %p258_p3, %p50_p0  ;;  %p265_p7 = scmp.lt.s32.totalorder %s2692_s12, 3 }
  0x13   : > { %s3270_s15 = scalar_select %p2789_p4, 1, 0 }
  0x14   : > { %s3271_s16 = scalar_select %p2794_p6, 1, 0 }
  0x15   : > { %p2799_p8 = pnand %p1914_p5, %p265_p7  ;;  %s2694_s18 = smov [#allocation8]  }
  0x16   : > { %3272 = sst [smem:[#allocation22_spill]] %s3271_s16  ;;  %s277_s19 = sshll.u32 %s2694_s18, 4  ;;  %s278_s19 = int_to_ptr.vmem [resolvable:$true] %s277_s19 }
  0x17   : > { %s3273_s17 = scalar_select %p2799_p8, 1, 0 }
  0x18   : > { %p2297_p9 = pneg %p2799_p8  ;;  %s2695_s21 = smov [#allocation11]  }
  0x19   : > { %s303_s22 = sshll.u32 %s2695_s21, 4  ;;  %s2439_s23 = scalar_lea.vmem %s278_s19, 2048  ;;  %s304_s22 = int_to_ptr.vmem [resolvable:$true] %s303_s22 }
  0x1a   : > { %p2808_p11 = pnand %p2297_p9, %p3257_p1  ;;  %p2440_p13 = scmp.ne.s32.totalorder %s278_s19, %s2439_s23 }
  0x1b   : > { %p2447_p5 = scmp.lt.s32.totalorder %s278_s19, %s278_s19  ;;  %p2448_p7 = scmp.lt.s32.totalorder %s2439_s23, %s2439_s23 }
  0x1c   : > { %s3274_s20 = scalar_select %p2808_p11, 1, 0 }
  0x1d   : > { %p3258_p12 = pneg %p2808_p11  ;;  %p2449_p10 = por %p2448_p7, %p2447_p5 }
  0x1f   : > { %p2442_p0 = pnand %p2440_p13, %p3258_p12 }
  0x21   : > { %p2443_p3 = pneg %p2442_p0 }
  0x23   : > { %p2450_p9 = pnand %p2449_p10, %p2443_p3 }
  0x25   : > { %2453 = shalt.err (!%p2450_p9)
}
  0x26   : > { %s3248_s24 = smov 128   ;;  %s3251_s25 = smov 8  }
  0x27   : > { %s3275_s3 = sld [smem:[#allocation26_spill]]  ;;  %s2465_s28 = scalar_lea.vmem %s304_s22, 2048 }
  0x28   : > { %p2466_p13 = scmp.ne.s32.totalorder %s304_s22, %s2465_s28  ;;  %p2473_p10 = scmp.lt.s32.totalorder %s304_s22, %s304_s22 }
  0x29   : > { %p2474_p3 = scmp.lt.s32.totalorder %s2465_s28, %s2465_s28 }
  0x2a   : > { %p2468_p0 = pnand %p2466_p13, %p3258_p12 }
  0x2b   : > { %p2475_p7 = por %p2474_p3, %p2473_p10 }
  0x2c   : > { %p2469_p5 = pneg %p2468_p0 }
  0x2d   : > { %2300 = dma.hbm_to_vmem [thread:$0]  (!%p2808_p11), %s3275_s3, 2048, %s278_s19, [#allocation9], %s3248_s24, %s3248_s24, %s3251_s25  }
  0x2e   : > { %p2476_p9 = pnand %p2475_p7, %p2469_p5 }
  0x30   : > { %2479 = shalt.err (!%p2476_p9)
}
  0x31   : > { %s3276_s5 = sld [smem:[#allocation27_spill]]  ;;  %s2837_s18 = sadd.s32 1, %s2692_s12  }
  0x32   : > { %3277 = sst [smem:[#allocation23_spill]] %s2837_s18  ;;  %s37_s19 = sadd.s32 1, %s2688_s11 }
  0x33   : > { %s34_s21 = ssub.s32 %s2692_s12, %s2837_s18  ;;  %p44_p13 = scmp.ne.s32.totalorder %s2688_s11, %s2684_s10 }
  0x34   : > { %p35_p0 = scmp.eq.s32.totalorder %s34_s21, 0  ;;  %p45_p5 = scmp.eq.s32.totalorder %s2692_s12, 0 }
  0x35   : > { %p2847_p10 = por %p252_p2, %p44_p13  ;;  %p2328_p3 = scmp.lt.s32.totalorder %s2692_s12, 2 }
  0x36   : > { %s2853_s26 = scalar_select %p35_p0, %s2688_s11, %s37_s19  }
  0x37   : > { %2306 = dma.hbm_to_vmem [thread:$0]  (!%p2808_p11), %s3276_s5, 2048, %s304_s22, [#allocation12], %s3248_s24, %s3248_s24, %s3251_s25  }
  0x38   : > { %s3278_s23 = scalar_select %p2847_p10, 1, 0 }
  0x39   : > { %3279 = sst [smem:[#allocation24_spill]] %s2853_s26  ;;  %p46_p7 = por %p45_p5, %p44_p13 }
  0x3a   : > { %s3250_s27 = sand.u32 1, %s2688_s11   ;;  %s2861_s28 = sshll.u32 %s2692_s12, 8 }
  0x3b   : > { %s2858_s22 = sshll.u32 %s3250_s27, 4  ;;  %p2863_p9 = pnand %p2328_p3, %p46_p7 }
  0x3c   : > { %s357_s14 = sand.u32 1, %s2692_s12   ;;  %s3281_s1 = sld [smem:[#allocation25_spill]] }
  0x3d   : > { %s361_s27 = scalar_lea.vmem [#allocation5], %s2858_s22  ;;  %s2698_s3 = smov [#allocation10]  }
  0x3e   : > { %s368_s25 = sshll.u32 %s361_s27, 4  ;;  %s2877_s5 = sshll.u32 %s2698_s3, 4  ;;  %s2875_s25 = int_to_ptr.vmem [resolvable:$true] %s368_s25  ;;  %s291_s5 = int_to_ptr.vmem [resolvable:$true] %s2877_s5 }
  0x3f   : > { %s2879_s26 = scalar_lea.sflag [#allocation6], %s357_s14  ;;  %p2885_p13 = pneg %p2863_p9 }
  0x42   : > { %s2872_s19 = scalar_lea.hbm %s3281_s1, %s2861_s28  ;;  %s2485_s21 = scalar_lea.hbm %s3281_s1, 512 }
  0x43   : > { %s2480_s18 = scalar_lea.hbm %s2872_s19, 256  ;;  %p2486_p3 = scmp.lt.s32.totalorder %s2872_s19, %s3281_s1 }
  0x44   : > { %p2481_p2 = scmp.ne.s32.totalorder %s2872_s19, %s2480_s18  ;;  %p2487_p7 = scmp.lt.s32.totalorder %s2485_s21, %s2480_s18 }
  0x46   : > { %p2483_p0 = pnand %p2885_p13, %p2481_p2  ;;  %p2488_p1 = por %p2487_p7, %p2486_p3 }
  0x48   : > { %p2484_p5 = pneg %p2483_p0 }
  0x4a   : > { %p2489_p12 = pnand %p2488_p1, %p2484_p5 }
  0x4c   : > { %2492 = shalt.err (!%p2489_p12)
}
  0x4d   : > { %s2493_s14 = scalar_lea.vmem %s2875_s25, 256  ;;  %s2699_s30 = smov [#allocation5]  }
  0x4e   : > { %p2494_p6 = scmp.ne.s32.totalorder %s2875_s25, %s2493_s14  ;;  %s2498_s24 = sshll.u32 %s2699_s30, 4  ;;  %s2499_s24 = int_to_ptr.vmem [resolvable:$false] %s2498_s24 }
  0x4f   : > { %s2500_s27 = scalar_lea.vmem %s2499_s24, 512  ;;  %p2501_p10 = scmp.lt.s32.totalorder %s2875_s25, %s2499_s24 }
  0x50   : > { %p2496_p2 = pnand %p2494_p6, %p2885_p13  ;;  %p2502_p4 = scmp.lt.s32.totalorder %s2500_s27, %s2493_s14 }
  0x52   : > { %p2497_p0 = pneg %p2496_p2  ;;  %p2503_p8 = por %p2502_p4, %p2501_p10 }
  0x54   : > { %p2504_p11 = pnand %p2503_p8, %p2497_p0 }
  0x56   : > { %2507 = shalt.err (!%p2504_p11)
}
  0x57   : > { %s3283_s16 = smov 8   ;;  %s3284_s18 = smov 128  }
  0x58   : > { %2316 = dma.hbm_to_vmem [thread:$0]  (!%p2863_p9), %s2872_s19, 256, %s2875_s25, %s2879_s26, %s3284_s18, %s3284_s18, %s3283_s16  }
  0x59   : > { %s2519_s30 = scalar_lea.vmem %s291_s5, 2048  ;;  %p3285_p6 = scmp.ne.s32.totalorder %s3274_s20, 0 }
  0x5a   : > { %p2520_p1 = scmp.ne.s32.totalorder %s291_s5, %s2519_s30  ;;  %p2527_p8 = scmp.lt.s32.totalorder %s291_s5, %s291_s5 }
  0x5b   : > { %p3286_p12 = pneg %p3285_p6  ;;  %p2528_p11 = scmp.lt.s32.totalorder %s2519_s30, %s2519_s30 }
  0x5d   : > { %p2522_p5 = pnand %p2520_p1, %p3286_p12  ;;  %p2529_p10 = por %p2528_p11, %p2527_p8 }
  0x5f   : > { %p2523_p4 = pneg %p2522_p5 }
  0x61   : > { %p2530_p3 = pnand %p2529_p10, %p2523_p4 }
  0x63   : > { %2533 = shalt.err (!%p2530_p3)
}
  0x64   : > { %2303 = dma.hbm_to_vmem [thread:$0]  (!%p3285_p6), %s3242_s4, 2048, %s291_s5, [#allocation9], %s3284_s18, %s3284_s18, %s3283_s16  }
  0x65   : > { %s2700_s25 = smov [#allocation13]   ;;  %p3287_p2 = pmov %p3286_p12 }
  0x66   : > { %s316_s19 = sshll.u32 %s2700_s25, 4  ;;  %s317_s19 = int_to_ptr.vmem [resolvable:$true] %s316_s19 }
  0x67   : > { %s2545_s14 = scalar_lea.vmem %s317_s19, 2048  ;;  %p2553_p12 = scmp.lt.s32.totalorder %s317_s19, %s317_s19 }
  0x68   : > { %p2546_p7 = scmp.ne.s32.totalorder %s317_s19, %s2545_s14  ;;  %p2554_p5 = scmp.lt.s32.totalorder %s2545_s14, %s2545_s14 }
  0x6a   : > { %p2548_p0 = pnand %p2546_p7, %p3287_p2  ;;  %p2555_p4 = por %p2554_p5, %p2553_p12 }
  0x6c   : > { %p2549_p1 = pneg %p2548_p0 }
  0x6e   : > { %p2556_p8 = pnand %p2555_p4, %p2549_p1 }
  0x70   : > { %2559 = shalt.err (!%p2556_p8)
}
  0x71   : > { %2309 = dma.hbm_to_vmem [thread:$0]  (!%p3285_p6), %s3244_s6, 2048, %s317_s19, [#allocation12], %s3284_s18, %s3284_s18, %s3283_s16  }
  0x72   : > { %s2938_s21 = scalar_lea.hbm %s3238_s0, %s2861_s28  ;;  %s340_s20 = scalar_lea.vmem [#allocation2], %s2858_s22 }
  0x73   : > { %s347_s3 = sshll.u32 %s340_s20, 4  ;;  %s3288_s25 = sand.u32 1, %s2688_s11   ;;  %s2941_s3 = int_to_ptr.vmem [resolvable:$true] %s347_s3 }
  0x74   : > { %s337_s14 = scalar_lea.sflag [#allocation3], %s3288_s25  ;;  %s2560_s5 = scalar_lea.hbm %s2938_s21, 256 }
  0x75   : > { %p2561_p11 = scmp.ne.s32.totalorder %s2938_s21, %s2560_s5  ;;  %s2565_s27 = scalar_lea.hbm %s3238_s0, 512 }
  0x76   : > { %p2566_p6 = scmp.lt.s32.totalorder %s2938_s21, %s3238_s0  ;;  %p2567_p7 = scmp.lt.s32.totalorder %s2565_s27, %s2560_s5 }
  0x77   : > { %p2563_p10 = pnand %p2561_p11, %p2885_p13 }
  0x78   : > { %p2568_p2 = por %p2567_p7, %p2566_p6 }
  0x79   : > { %p2564_p3 = pneg %p2563_p10 }
  0x7b   : > { %p2569_p0 = pnand %p2568_p2, %p2564_p3 }
  0x7d   : > { %2572 = shalt.err (!%p2569_p0)
}
  0x7e   : > { %s2573_s20 = scalar_lea.vmem %s2941_s3, 256  ;;  %s2701_s25 = smov [#allocation2]  }
  0x7f   : > { %p2574_p1 = scmp.ne.s32.totalorder %s2941_s3, %s2573_s20  ;;  %s2578_s19 = sshll.u32 %s2701_s25, 4  ;;  %s2579_s19 = int_to_ptr.vmem [resolvable:$false] %s2578_s19 }
  0x80   : > { %s2580_s24 = scalar_lea.vmem %s2579_s19, 512  ;;  %p2581_p4 = scmp.lt.s32.totalorder %s2941_s3, %s2579_s19 }
  0x81   : > { %p2576_p12 = pnand %p2574_p1, %p2885_p13  ;;  %p2582_p8 = scmp.lt.s32.totalorder %s2580_s24, %s2573_s20 }
  0x83   : > { %p2577_p5 = pneg %p2576_p12  ;;  %p2583_p11 = por %p2582_p8, %p2581_p4 }
  0x85   : > { %p2584_p10 = pnand %p2583_p11, %p2577_p5 }
  0x87   : > { %2587 = shalt.err (!%p2584_p10)
}
  0x88   : > { %2313 = dma.hbm_to_vmem [thread:$0]  (!%p2863_p9), %s2938_s21, 256, %s2941_s3, %s337_s14, %s3284_s18, %s3284_s18, %s3283_s16  }
  0x89   : > { %s2972_s27 = scalar_lea.hbm %s3240_s2, %s2861_s28  ;;  %s382_s30 = scalar_lea.vmem [#allocation7], %s2858_s22 }
  0x8a   : > { %s389_s20 = sshll.u32 %s382_s30, 4  ;;  %s2588_s25 = scalar_lea.hbm %s2972_s27, 256  ;;  %s390_s20 = int_to_ptr.vmem [resolvable:$true] %s389_s20 }
  0x8b   : > { %p2589_p3 = scmp.ne.s32.totalorder %s2972_s27, %s2588_s25  ;;  %s2593_s21 = scalar_lea.hbm %s3240_s2, 512 }
  0x8c   : > { %p2594_p2 = scmp.lt.s32.totalorder %s2972_s27, %s3240_s2  ;;  %p2595_p0 = scmp.lt.s32.totalorder %s2593_s21, %s2588_s25 }
  0x8d   : > { %p2591_p6 = pnand %p2589_p3, %p2885_p13 }
  0x8e   : > { %p2596_p1 = por %p2595_p0, %p2594_p2 }
  0x8f   : > { %p2592_p7 = pneg %p2591_p6 }
  0x91   : > { %p2597_p12 = pnand %p2596_p1, %p2592_p7 }
  0x93   : > { %2600 = shalt.err (!%p2597_p12)
}
  0x94   : > { %s2601_s22 = scalar_lea.vmem %s390_s20, 256  ;;  %s2702_s28 = smov [#allocation7]  }
  0x95   : > { %p2602_p5 = scmp.ne.s32.totalorder %s390_s20, %s2601_s22  ;;  %s2606_s1 = sshll.u32 %s2702_s28, 4  ;;  %s2607_s1 = int_to_ptr.vmem [resolvable:$false] %s2606_s1 }
  0x96   : > { %s2608_s5 = scalar_lea.vmem %s2607_s1, 512  ;;  %p2609_p11 = scmp.lt.s32.totalorder %s390_s20, %s2607_s1 }
  0x97   : > { %p2604_p4 = pnand %p2602_p5, %p2885_p13  ;;  %p2610_p10 = scmp.lt.s32.totalorder %s2608_s5, %s2601_s22 }
  0x99   : > { %p2605_p8 = pneg %p2604_p4  ;;  %p2611_p3 = por %p2610_p10, %p2609_p11 }
  0x9b   : > { %p2612_p6 = pnand %p2611_p3, %p2605_p8 }
  0x9d   : > { %2615 = shalt.err (!%p2612_p6)
}
  0x9e   : > { %2319 = dma.hbm_to_vmem [thread:$0]  (!%p2863_p9), %s2972_s27, 256, %s390_s20, %s2879_s26, %s3284_s18, %s3284_s18, %s3283_s16  }
  0x9f   : > { %p3289_p13 = scmp.ne.s32.totalorder %s3273_s17, 0 }
  0xa0   : > { %s2998_s12 = sand.u32 (!%p3289_p13), 1, %s2684_s10   ;;  %p3290_p7 = scmp.ne.s32.totalorder (!%p3289_p13), %s3270_s15, 0 }
  0xa1   : > { %401 = sbr.rel (%p3289_p13) target bundleno = 2560 (0xa00), region = 56  ;;  %s3001_s30 = sshll.u32 (!%p3289_p13), %s2998_s12, 4 }
  0xa2   : > { %s404_s25 = scalar_lea.sflag (!%p3289_p13), [#allocation3], %s2998_s12  ;;  %s407_s29 = scalar_lea.vmem (!%p3289_p13), [#allocation2], %s3001_s30 }
  0xa6   : > { %2659 = dma.done.wait (%p3290_p7), %s404_s25, 256  }
  0xa7   : > { %2661 = vsyncadd (%p3290_p7), %s404_s25, 4294967040  ;;  %s412_s17 = sand.u32 1, %s2780_s13   ;;  %s416_s16 = scalar_lea.vmem [#allocation5], %s3001_s30 }
  0xa8   : > { %s413_s26 = scalar_lea.sflag [#allocation6], %s412_s17 }
  0xa9   : > { %2663 = dma.done.wait (%p3290_p7), %s413_s26, 512  }
  0xaa   : > { %2665 = vsyncadd (%p3290_p7), %s413_s26, 4294966784  ;;  %s425_s18 = scalar_lea.vmem [#allocation7], %s3001_s30  ;;  %p3291_p9 = scmp.eq.s32.totalorder %s2780_s13, 0 }
  0xac   : > { %2667 = dma.done.wait (%p3291_p9), [#allocation9], 4096   ;;  %p3292_p2 = pmov %p3291_p9 }
  0xae   : > { %2669 = vsyncadd (%p3292_p2), [#allocation9], 4294963200  ;;  %p3293_p0 = pmov %p3292_p2 }
  0xb0   : > { %2671 = dma.done.wait (%p3293_p0), [#allocation12], 4096   ;;  %p3294_p1 = pmov %p3293_p0 }
  0xb1   : > { %v507_v0 = vld [vmem:[#allocation8 + $0x78] sm:$0xff]  ;;  %v506_v2 = vld [vmem:[#allocation8 + $0x70] sm:$0xff]  ;;  %v505_v4 = vld [vmem:[#allocation8 + $0x68] sm:$0xff]  ;;  %vm765_vm0 = vcmask 261120   ;;  %s2703_s15 = smov 96   ;;  %s2704_s27 = smov 64  }
  0xb2   : > { %2673 = vsyncadd (%p3294_p1), [#allocation12], 4294963200  ;;  %v598_v1 = vld [vmem:[#allocation10 + $0x78] sm:$0xff]  ;;  %2077 = vmatprep.subr.mxu0 %v507_v0  ;;  %v597_v3 = vld [vmem:[#allocation10 + $0x70] sm:$0xff]  ;;  %vm855_vm1 = vcmask 130048   ;;  %s2705_s20 = smov 32  }
  0xb3   : > { %2112 = vmatprep.subr.mxu1 %v598_v1  ;;  %2078 = vmatpush3.msra.mxu0 %v507_v0  ;;  %v596_v5 = vld [vmem:[#allocation10 + $0x68] sm:$0xff]  ;;  %v504_v6 = vld [vmem:[#allocation8 + $0x60] sm:$0xff]  ;;  %v503_v8 = vld [vmem:[#allocation8 + $0x58] sm:$0xff]  ;;  %vm1601_vm2 = vcmask 523264   ;;  %vm1604_vm3 = vcmask 785408   ;;  %s1972_s14 = sshll.u32 %s2780_s13, 8 }
  0xb4   : > { %2113 = vmatpush3.msra.mxu1 %v598_v1  ;;  %2079 = vmatprep.subr.mxu0 %v506_v2  ;;  %v595_v7 = vld [vmem:[#allocation10 + $0x60] sm:$0xff]  ;;  %v594_v9 = vld [vmem:[#allocation10 + $0x58] sm:$0xff]  ;;  %v502_v10 = vld [vmem:[#allocation8 + $0x50] sm:$0xff]  ;;  %s485_s22 = scalar_lea.vmem [#allocation14], %s3001_s30  ;;  %s3193_s25 = scalar_lea.hbm %s3247_s9, %s1972_s14 }
  0xb5   : > { %2114 = vmatprep.subr.mxu1 %v597_v3  ;;  %2080 = vmatpush3.msra.mxu0 %v506_v2  ;;  %v593_v11 = vld [vmem:[#allocation10 + $0x50] sm:$0xff]  ;;  %v501_v12 = vld [vmem:[#allocation8 + $0x48] sm:$0xff]  ;;  %v500_v14 = vld [vmem:[#allocation8 + $0x40] sm:$0xff]  ;;  %s1759_s28 = sshll.u32 %s485_s22, 4  ;;  %p3295_p5 = scmp.ne.s32.totalorder %s3278_s23, 0  ;;  %s3195_s28 = int_to_ptr.vmem [resolvable:$true] %s1759_s28 }
  0xb6   : > { %2115 = vmatpush3.msra.mxu1 %v597_v3  ;;  %2081 = vmatprep.subr.mxu0 %v505_v4  ;;  %v592_v13 = vld [vmem:[#allocation10 + $0x48] sm:$0xff]  ;;  %v591_v15 = vld [vmem:[#allocation10 + $0x40] sm:$0xff]  ;;  %v499_v16 = vld [vmem:[#allocation8 + $0x38] sm:$0xff]  ;;  %s2616_s17 = scalar_lea.vmem %s3195_s28, 256  ;;  %s2706_s13 = smov [#allocation14]  }
  0xb7   : > { %2116 = vmatprep.subr.mxu1 %v596_v5  ;;  %2082 = vmatpush3.msra.mxu0 %v505_v4  ;;  %v590_v17 = vld [vmem:[#allocation10 + $0x38] sm:$0xff]  ;;  %v498_v18 = vld [vmem:[#allocation8 + $0x30] sm:$0xff]  ;;  %v497_v20 = vld [vmem:[#allocation8 + $0x28] sm:$0xff]  ;;  %p2617_p12 = scmp.ne.s32.totalorder %s3195_s28, %s2616_s17  ;;  %s2620_s30 = sshll.u32 %s2706_s13, 4  ;;  %s2621_s30 = int_to_ptr.vmem [resolvable:$false] %s2620_s30 }
  0xb8   : > { %2117 = vmatpush3.msra.mxu1 %v596_v5  ;;  %2083 = vmatprep.subr.mxu0 %v504_v6  ;;  %v589_v19 = vld [vmem:[#allocation10 + $0x30] sm:$0xff]  ;;  %v588_v21 = vld [vmem:[#allocation10 + $0x28] sm:$0xff]  ;;  %v496_v22 = vld [vmem:[#allocation8 + $0x20] sm:$0xff]  ;;  %s2622_s26 = scalar_lea.vmem %s2621_s30, 512  ;;  %p2623_p11 = scmp.lt.s32.totalorder %s3195_s28, %s2621_s30 }
  0xb9   : > { %2118 = vmatprep.subr.mxu1 %v595_v7  ;;  %2084 = vmatpush3.msra.mxu0 %v504_v6  ;;  %v587_v23 = vld [vmem:[#allocation10 + $0x20] sm:$0xff]  ;;  %v495_v24 = vld [vmem:[#allocation8 + $0x18] sm:$0xff]  ;;  %v494_v26 = vld [vmem:[#allocation8 + $0x10] sm:$0xff]  ;;  %p2618_p4 = pnand %p2617_p12, %p3295_p5  ;;  %p2624_p10 = scmp.lt.s32.totalorder %s2622_s26, %s2616_s17 }
  0xba   : > { %2119 = vmatpush3.msra.mxu1 %v595_v7  ;;  %2085 = vmatprep.subr.mxu0 %v503_v8  ;;  %v586_v25 = vld [vmem:[#allocation10 + $0x18] sm:$0xff]  ;;  %v585_v27 = vld [vmem:[#allocation10 + $0x10] sm:$0xff]  ;;  %v493_v28 = vld [vmem:[#allocation8 + $0x8] sm:$0xff] }
  0xbb   : > { %2120 = vmatprep.subr.mxu1 %v594_v9  ;;  %2086 = vmatpush3.msra.mxu0 %v503_v8  ;;  %v584_v29 = vld [vmem:[#allocation10 + $0x8] sm:$0xff]  ;;  %v492_v30 = vld [vmem:[#allocation8] sm:$0xff]  ;;  %v689_v33 = vld [vmem:[#allocation11 + $0x78] sm:$0xff]  ;;  %p2619_p8 = pneg %p2618_p4  ;;  %p2625_p3 = por %p2624_p10, %p2623_p11 }
  0xbc   : > { %2121 = vmatpush3.msra.mxu1 %v594_v9  ;;  %2087 = vmatprep.subr.mxu0 %v502_v10  ;;  %v583_v31 = vld [vmem:[#allocation10] sm:$0xff]  ;;  %v489_v34 = vld [vmem:[%s416_s16 + $0x8] sm:$0xff]  ;;  %v688_v37 = vld [vmem:[#allocation11 + $0x70] sm:$0xff] }
  0xbd   : > { %2122 = vmatprep.subr.mxu1 %v593_v11  ;;  %2088 = vmatpush3.msra.mxu0 %v502_v10  ;;  %v488_v32 = vld [vmem:[%s416_s16] sm:$0xff]  ;;  %v3030_v35 = vld [vmem:[%s407_s29 + $0x8] sm:$0xff]  ;;  %p2626_p6 = pnand %p2625_p3, %p2619_p8 }
  0xbe   : > { %2123 = vmatpush3.msra.mxu1 %v593_v11  ;;  %2089 = vmatprep.subr.mxu0 %v501_v12  ;;  %v490_v36 = vld [vmem:[%s425_s18] sm:$0xff]  ;;  %v687_v38 = vld [vmem:[#allocation11 + $0x68] sm:$0xff]  ;;  %v685_v40 = vld [vmem:[#allocation11 + $0x58] sm:$0xff] }
  0xbf   : > { %2124 = vmatprep.subr.mxu1 %v592_v13  ;;  %2090 = vmatpush3.msra.mxu0 %v501_v12  ;;  %v686_v39 = vld [vmem:[#allocation11 + $0x60] sm:$0xff]  ;;  %v684_v41 = vld [vmem:[#allocation11 + $0x50] sm:$0xff]  ;;  %v683_v42 = vld [vmem:[#allocation11 + $0x48] sm:$0xff] }
  0xc0   : > { %2125 = vmatpush3.msra.mxu1 %v592_v13  ;;  %2091 = vmatprep.subr.mxu0 %v500_v14  ;;  %v682_v43 = vld [vmem:[#allocation11 + $0x40] sm:$0xff]  ;;  %v681_v44 = vld [vmem:[#allocation11 + $0x38] sm:$0xff]  ;;  %v680_v45 = vld [vmem:[#allocation11 + $0x30] sm:$0xff] }
  0xc1   : > { %2126 = vmatprep.subr.mxu1 %v591_v15  ;;  %2092 = vmatpush3.msra.mxu0 %v500_v14  ;;  %v679_v46 = vld [vmem:[#allocation11 + $0x28] sm:$0xff]  ;;  %v678_v47 = vld [vmem:[#allocation11 + $0x20] sm:$0xff]  ;;  %v677_v48 = vld [vmem:[#allocation11 + $0x18] sm:$0xff] }
  0xc2   : > { %2127 = vmatpush3.msra.mxu1 %v591_v15  ;;  %2093 = vmatprep.subr.mxu0 %v499_v16  ;;  %v676_v49 = vld [vmem:[#allocation11 + $0x10] sm:$0xff]  ;;  %v675_v50 = vld [vmem:[#allocation11 + $0x8] sm:$0xff]  ;;  %v674_v51 = vld [vmem:[#allocation11] sm:$0xff] }
  0xc3   : > { %2128 = vmatprep.subr.mxu1 %v590_v17  ;;  %2094 = vmatpush3.msra.mxu0 %v499_v16  ;;  %v491_v52 = vld [vmem:[%s425_s18 + $0x8] sm:$0xff] }
  0xc4   : > { %2129 = vmatpush3.msra.mxu1 %v590_v17  ;;  %2095 = vmatprep.subr.mxu0 %v498_v18 }
  0xc5   : > { %2130 = vmatprep.subr.mxu1 %v589_v19  ;;  %2096 = vmatpush3.msra.mxu0 %v498_v18 }
  0xc6   : > { %2131 = vmatpush3.msra.mxu1 %v589_v19  ;;  %2097 = vmatprep.subr.mxu0 %v497_v20 }
  0xc7   : > { %2132 = vmatprep.subr.mxu1 %v588_v21  ;;  %2098 = vmatpush3.msra.mxu0 %v497_v20 }
  0xc8   : > { %2133 = vmatpush3.msra.mxu1 %v588_v21  ;;  %2099 = vmatprep.subr.mxu0 %v496_v22 }
  0xc9   : > { %2134 = vmatprep.subr.mxu1 %v587_v23  ;;  %2100 = vmatpush3.msra.mxu0 %v496_v22 }
  0xca   : > { %2135 = vmatpush3.msra.mxu1 %v587_v23  ;;  %2101 = vmatprep.subr.mxu0 %v495_v24 }
  0xcb   : > { %2136 = vmatprep.subr.mxu1 %v586_v25  ;;  %2102 = vmatpush3.msra.mxu0 %v495_v24 }
  0xcc   : > { %2137 = vmatpush3.msra.mxu1 %v586_v25  ;;  %2103 = vmatprep.subr.mxu0 %v494_v26 }
  0xcd   : > { %2138 = vmatprep.subr.mxu1 %v585_v27  ;;  %2104 = vmatpush3.msra.mxu0 %v494_v26 }
  0xce   : > { %2139 = vmatpush3.msra.mxu1 %v585_v27  ;;  %2105 = vmatprep.subr.mxu0 %v493_v28 }
  0xcf   : > { %2140 = vmatprep.subr.mxu1 %v584_v29  ;;  %2106 = vmatpush3.msra.mxu0 %v493_v28 }
  0xd0   : > { %2141 = vmatpush3.msra.mxu1 %v584_v29  ;;  %2107 = vmatprep.subr.mxu0 %v492_v30 }
  0xd1   : > { %2142 = vmatprep.subr.mxu1 %v583_v31  ;;  %2108 = vmatpush3.msra.mxu0 %v492_v30 }
  0xd2   : > { %2143 = vmatpush3.msra.mxu1 %v583_v31  ;;  %2144 = vmatprep.mubr.f32.mxu1 %v488_v32 }
  0xd3   : > { %2147 = vmatprep.subr.mxu0 %v689_v33  ;;  %2145 = vmatmul.mubr.f32.vlgmr.msra.gmra.mxu1 %v489_v34 }
  0xd4   : > { %2110 = vmatmul.mubr.f32.vlgmr.msra.gmra.mxu0 %v3030_v35 }
  0xd5   : > { %2148 = vmatpush3.msra.mxu0 %v689_v33  ;;  %2179 = vmatprep.mubr.f32.mxu0 %v490_v36 }
  0xd6   : > { %2149 = vmatprep.subr.mxu0 %v688_v37 }
  0xd7   : > { %2150 = vmatpush3.msra.mxu0 %v688_v37 }
  0xd8   : > { %2151 = vmatprep.subr.mxu0 %v687_v38 }
  0xd9   : > { %2152 = vmatpush3.msra.mxu0 %v687_v38 }
  0xda   : > { %2153 = vmatprep.subr.mxu0 %v686_v39 }
  0xdb   : > { %2154 = vmatpush3.msra.mxu0 %v686_v39 }
  0xdc   : > { %2155 = vmatprep.subr.mxu0 %v685_v40 }
  0xdd   : > { %2156 = vmatpush3.msra.mxu0 %v685_v40 }
  0xde   : > { %2157 = vmatprep.subr.mxu0 %v684_v41 }
  0xdf   : > { %2158 = vmatpush3.msra.mxu0 %v684_v41 }
  0xe0   : > { %2159 = vmatprep.subr.mxu0 %v683_v42 }
  0xe1   : > { %2160 = vmatpush3.msra.mxu0 %v683_v42 }
  0xe2   : > { %2161 = vmatprep.subr.mxu0 %v682_v43 }
  0xe3   : > { %2162 = vmatpush3.msra.mxu0 %v682_v43 }
  0xe4   : > { %2163 = vmatprep.subr.mxu0 %v681_v44 }
  0xe5   : > { %2164 = vmatpush3.msra.mxu0 %v681_v44 }
  0xe6   : > { %2165 = vmatprep.subr.mxu0 %v680_v45 }
  0xe7   : > { %2166 = vmatpush3.msra.mxu0 %v680_v45 }
  0xe8   : > { %2167 = vmatprep.subr.mxu0 %v679_v46 }
  0xe9   : > { %2168 = vmatpush3.msra.mxu0 %v679_v46 }
  0xea   : > { %2169 = vmatprep.subr.mxu0 %v678_v47 }
  0xeb   : > { %2170 = vmatpush3.msra.mxu0 %v678_v47 }
  0xec   : > { %2171 = vmatprep.subr.mxu0 %v677_v48 }
  0xed   : > { %2172 = vmatpush3.msra.mxu0 %v677_v48 }
  0xee   : > { %2173 = vmatprep.subr.mxu0 %v676_v49 }
  0xef   : > { %2174 = vmatpush3.msra.mxu0 %v676_v49 }
  0xf0   : > { %2175 = vmatprep.subr.mxu0 %v675_v50 }
  0xf1   : > { %2176 = vmatpush3.msra.mxu0 %v675_v50 }
  0xf2   : > { %2177 = vmatprep.subr.mxu0 %v674_v51 }
  0xf3   : > { %2178 = vmatpush3.msra.mxu0 %v674_v51 }
  0xf4   : > { %2180 = vmatmul.mubr.f32.vlgmr.msra.gmra.mxu0 %v491_v52 }
 0x193   : > { %v3037_v53 = vpop.f32.mrf.mxu1 }
 0x194   : > { %v3039_v54 = vpop.f32.mrf.mxu0  ;;  %967 = vrot.lane.b32.xlu1 %v3037_v53, %s2703_s15  ;;  %2182 = vmatprep.subr.msk.mxu1 %vm765_vm0, %v3037_v53 }
 0x195   : > { %v3045_v55 = vpop.f32.mrf.mxu1  ;;  %2183 = vmatpush3.xpose.msk.msra.mxu1 %vm765_vm0, %v3037_v53 }
 0x196   : > { %v3049_v56 = vpop.f32.mrf.mxu0  ;;  %2184 = vmatprep.subr.msk.mxu1 %vm765_vm0, %v3045_v55 }
 0x197   : > { %2186 = vmatprep.mubr.msk.f32.mxu1 %vm765_vm0, %v3049_v56 }
 0x198   : > { %965 = vrot.lane.b32.xlu1 %v3045_v55, %s2703_s15 }
 0x199   : > { %2185 = vmatpush3.xpose.msk.msra.mxu1 %vm765_vm0, %v3045_v55 }
 0x19c   : > { %963 = vrot.lane.b32.xlu1 %v3039_v54, %s2703_s15  ;;  %2187 = vmatmul.mubr.msk.f32.vlgmr.msra.gmra.mxu1 %vm765_vm0, %v3039_v54 }
 0x1b4   : > { %v3063_v57 = vpop.f32.mrf.mxu0 }
 0x1b5   : > { %1080 = vrot.lane.b32.xlu1 %v3063_v57, %s2703_s15  ;;  %2189 = vmatprep.subr.mxu1 %v3063_v57 }
 0x1b6   : > { %v3068_v58 = vpop.f32.mrf.mxu0  ;;  %2190 = vmatpush3.msra.mxu1 %v3063_v57 }
 0x1b7   : > { %2191 = vmatprep.subr.mxu1 %v3068_v58 }
 0x1b8   : > { %2192 = vmatpush3.msra.mxu1 %v3068_v58 }
 0x1b9   : > { %1173 = vrot.lane.b32.xlu1 %v3037_v53, %s2704_s27 }
 0x1bd   : > { %1171 = vrot.lane.b32.xlu1 %v3045_v55, %s2704_s27 }
 0x206   : > { %v968_v59 = vpop.permute.xlu1 %967 }
 0x207   : > { %2196 = vmatprep.subr.msk.mxu1 %vm765_vm0, %v968_v59 }
 0x20a   : > { %v966_v9 = vpop.permute.xlu1 %965 }
 0x20e   : > { %v964_v12 = vpop.permute.xlu1 %963 }
 0x227   : > { %v1081_v13 = vpop.permute.xlu1 %1080 }
 0x22b   : > { %v1174_v22 = vpop.permute.xlu1 %1173 }
 0x22f   : > { %v1172_v23 = vpop.permute.xlu1 %1171 }
 0x25c   : > { %v2188_v60 = vpop.f32.mrf.mxu1 }
 0x25d   : > { %v854_v63 = vmul.f32 0.17677669, %v2188_v60 }
 0x25e   : > { %v844_v61 = vpop.f32.mrf.mxu1 }
 0x25f   : > { %v853_v62 = vmul.f32 0.17677669, %v844_v61  ;;  %v859_v1 = vsel %vm855_vm1, %v854_v63, -inf }
 0x261   : > { %v856_v0 = vsel %vm855_vm1, %v853_v62, -inf }
 0x262   : > { %857 = vmax.xlane.f32.xlu0 %v856_v0 }
 0x266   : > { %860 = vmax.xlane.f32.xlu0 %v859_v1 }
 0x27c   : > { %961 = vrot.lane.b32.xlu0 %v3049_v56, %s2703_s15 }
 0x2eb   : > { %v858_v2 = vpop.xlane.xlu0 %857 }
 0x2ec   : > { %v862_v3 = vsub.f32 %v853_v62, %v858_v2 }
 0x2ee   : > { %v864_v4 = vmul.f32 1.442695, %v862_v3 }
 0x2ef   : > { %v861_v5 = vpop.xlane.xlu0 %860 }
 0x2f0   : > { %2392 = vpow2.f32 %v864_v4  ;;  %v863_v6 = vsub.f32 %v854_v63, %v861_v5 }
 0x2f2   : > { %v866_v7 = vmul.f32 1.442695, %v863_v6 }
 0x2f3   : > { %v962_v11 = vpop.permute.xlu0 %961 }
 0x2f4   : > { %2394 = vpow2.f32 %v866_v7 }
 0x2fd   : > { %v3082_v8 = vpop.eup %2392 }
 0x2fe   : > { %2193 = vmatprep.mubr.msk.f32.mxu1 %vm855_vm1, %v3082_v8 }
 0x301   : > { %v3086_v10 = vpop.eup %2394 }
 0x302   : > { %2194 = vmatmul.mubr.msk.f32.vlgmr.msra.gmra.mxu1 %vm855_vm1, %v3086_v10 }
 0x303   : > { %2197 = vmatpush3.xpose.msk.msra.mxu1 %vm765_vm0, %v968_v59  ;;  %2200 = vmatprep.mubr.msk.f32.mxu1 %vm765_vm0, %v962_v11 }
 0x304   : > { %2198 = vmatprep.subr.msk.mxu1 %vm765_vm0, %v966_v9 }
 0x307   : > { %2199 = vmatpush3.xpose.msk.msra.mxu1 %vm765_vm0, %v966_v9 }
 0x308   : > { %2203 = vmatprep.subr.mxu1 %v1081_v13 }
 0x30a   : > { %2201 = vmatmul.mubr.msk.f32.vlgmr.msra.gmra.mxu1 %vm765_vm0, %v964_v12 }
 0x30b   : > { %2204 = vmatpush3.msra.mxu1 %v1081_v13 }
 0x3c2   : > { %v3095_v14 = vpop.f32.mrf.mxu1 }
 0x3c4   : > { %v3097_v15 = vpop.f32.mrf.mxu1 }
 0x3ca   : > { %v2202_v16 = vpop.f32.mrf.mxu1 }
 0x3cb   : > { %v1053_v17 = vmul.f32 0.17677669, %v2202_v16 }
 0x3cc   : > { %v1043_v18 = vpop.f32.mrf.mxu1 }
 0x3cd   : > { %v1052_v19 = vmul.f32 0.17677669, %v1043_v18  ;;  %v1057_v20 = vsel %vm855_vm1, %v1053_v17, -inf }
 0x3ce   : > { %1058 = vmax.xlane.f32.xlu0 %v1057_v20 }
 0x3cf   : > { %v1054_v21 = vsel %vm855_vm1, %v1052_v19, -inf }
 0x3d0   : > { %1055 = vmax.xlane.f32.xlu1 %v1054_v21 }
 0x3e1   : > { %1167 = vrot.lane.b32.xlu1 %v3049_v56, %s2704_s27 }
 0x3e4   : > { %1078 = vrot.lane.b32.xlu0 %v3068_v58, %s2703_s15 }
 0x3e5   : > { %1169 = vrot.lane.b32.xlu1 %v3039_v54, %s2704_s27 }
 0x3e9   : > { %1282 = vrot.lane.b32.xlu1 %v3068_v58, %s2704_s27 }
 0x457   : > { %v1059_v24 = vpop.xlane.xlu0 %1058 }
 0x458   : > { %v1061_v25 = vsub.f32 %v1053_v17, %v1059_v24 }
 0x459   : > { %v1056_v26 = vpop.xlane.xlu1 %1055 }
 0x45a   : > { %v1060_v27 = vsub.f32 %v1052_v19, %v1056_v26  ;;  %v1064_v28 = vmul.f32 1.442695, %v1061_v25 }
 0x45b   : > { %v1079_v29 = vpop.permute.xlu0 %1078 }
 0x45c   : > { %v1062_v30 = vmul.f32 1.442695, %v1060_v27  ;;  %2205 = vmatprep.subr.mxu1 %v1079_v29 }
 0x45d   : > { %2206 = vmatpush3.msra.mxu1 %v1079_v29  ;;  %v1168_v33 = vpop.permute.xlu1 %1167 }
 0x45e   : > { %2396 = vpow2.f32 %v1062_v30  ;;  %2210 = vmatprep.subr.msk.mxu1 %vm765_vm0, %v1174_v22 }
 0x45f   : > { %2398 = vpow2.f32 %v1064_v28 }
 0x461   : > { %v1170_v34 = vpop.permute.xlu1 %1169 }
 0x465   : > { %v1283_v44 = vpop.permute.xlu1 %1282 }
 0x46b   : > { %v3110_v31 = vpop.eup %2396 }
 0x46c   : > { %v3112_v32 = vpop.eup %2398  ;;  %2207 = vmatprep.mubr.msk.f32.mxu1 %vm855_vm1, %v3110_v31  ;;  %v1066_v5 = vsel %vm855_vm1, %v3110_v31, 0.0 }
 0x46d   : > { %2208 = vmatmul.mubr.msk.f32.vlgmr.msra.gmra.mxu1 %vm855_vm1, %v3112_v32  ;;  %v1069_v4 = vsel %vm855_vm1, %v3112_v32, 0.0 }
 0x46e   : > { %2211 = vmatpush3.xpose.msk.msra.mxu1 %vm765_vm0, %v1174_v22  ;;  %2214 = vmatprep.mubr.msk.f32.mxu1 %vm765_vm0, %v1168_v33  ;;  %v871_v22 = vsel %vm855_vm1, %v3086_v10, 0.0 }
 0x46f   : > { %2212 = vmatprep.subr.msk.mxu1 %vm765_vm0, %v1172_v23 }
 0x472   : > { %2213 = vmatpush3.xpose.msk.msra.mxu1 %vm765_vm0, %v1172_v23  ;;  %v868_v23 = vsel %vm855_vm1, %v3082_v8, 0.0 }
 0x475   : > { %2215 = vmatmul.mubr.msk.f32.vlgmr.msra.gmra.mxu1 %vm765_vm0, %v1170_v34 }
 0x52d   : > { %v3123_v36 = vpop.f32.mrf.mxu1 }
 0x52f   : > { %v3125_v37 = vpop.f32.mrf.mxu1 }
 0x535   : > { %v2216_v38 = vpop.f32.mrf.mxu1 }
 0x536   : > { %v1259_v39 = vmul.f32 0.17677669, %v2216_v38 }
 0x537   : > { %v1249_v40 = vpop.f32.mrf.mxu1 }
 0x538   : > { %v1258_v41 = vmul.f32 0.17677669, %v1249_v40  ;;  %v1263_v42 = vsel %vm855_vm1, %v1259_v39, -inf  ;;  %v1621_v40 = vld [vmem:[#allocation13 + $0x70] sm:$0xff] }
 0x539   : > { %1264 = vmax.xlane.f32.xlu0 %v1263_v42  ;;  %v1617_v42 = vld [vmem:[#allocation13 + $0x50] sm:$0xff] }
 0x53a   : > { %v1260_v43 = vsel %vm855_vm1, %v1258_v41, -inf }
 0x53b   : > { %1261 = vmax.xlane.f32.xlu1 %v1260_v43  ;;  %v1616_v43 = vld [vmem:[#allocation13 + $0x48] sm:$0xff] }
 0x54c   : > { %1377 = vrot.lane.b32.xlu1 %v3037_v53, %s2705_s20 }
 0x54f   : > { %1284 = vrot.lane.b32.xlu0 %v3063_v57, %s2704_s27 }
 0x550   : > { %1371 = vrot.lane.b32.xlu1 %v3049_v56, %s2705_s20 }
 0x553   : > { %1375 = vrot.lane.b32.xlu0 %v3045_v55, %s2705_s20 }
 0x557   : > { %1373 = vrot.lane.b32.xlu0 %v3039_v54, %s2705_s20 }
 0x5c2   : > { %v1265_v45 = vpop.xlane.xlu0 %1264 }
 0x5c3   : > { %v1267_v46 = vsub.f32 %v1259_v39, %v1265_v45  ;;  %v1622_v39 = vld [vmem:[#allocation13 + $0x78] sm:$0xff] }
 0x5c4   : > { %v1262_v47 = vpop.xlane.xlu1 %1261  ;;  %2238 = vmatprep.subr.mxu0 %v1622_v39  ;;  %v1614_v45 = vld [vmem:[#allocation13 + $0x38] sm:$0xff] }
 0x5c5   : > { %v1266_v48 = vsub.f32 %v1258_v41, %v1262_v47  ;;  %v1270_v49 = vmul.f32 1.442695, %v1267_v46  ;;  %2239 = vmatpush3.msra.mxu0 %v1622_v39  ;;  %v1620_v41 = vld [vmem:[#allocation13 + $0x68] sm:$0xff]  ;;  %v1613_v46 = vld [vmem:[#allocation13 + $0x30] sm:$0xff] }
 0x5c6   : > { %v1285_v50 = vpop.permute.xlu0 %1284  ;;  %2240 = vmatprep.subr.mxu0 %v1621_v40  ;;  %v1612_v47 = vld [vmem:[#allocation13 + $0x28] sm:$0xff] }
 0x5c7   : > { %v1268_v51 = vmul.f32 1.442695, %v1266_v48  ;;  %2217 = vmatprep.subr.mxu1 %v1285_v50  ;;  %2241 = vmatpush3.msra.mxu0 %v1621_v40  ;;  %v1611_v48 = vld [vmem:[#allocation13 + $0x20] sm:$0xff] }
 0x5c8   : > { %2218 = vmatpush3.msra.mxu1 %v1285_v50  ;;  %v1378_v52 = vpop.permute.xlu1 %1377  ;;  %2242 = vmatprep.subr.mxu0 %v1620_v41  ;;  %v1609_v50 = vld [vmem:[#allocation13 + $0x10] sm:$0xff] }
 0x5c9   : > { %2400 = vpow2.f32 %v1268_v51  ;;  %2219 = vmatprep.subr.mxu1 %v1283_v44  ;;  %2243 = vmatpush3.msra.mxu0 %v1620_v41 }
 0x5ca   : > { %2402 = vpow2.f32 %v1270_v49  ;;  %2220 = vmatpush3.msra.mxu1 %v1283_v44  ;;  %v1376_v56 = vpop.permute.xlu0 %1375  ;;  %v1615_v44 = vld [vmem:[#allocation13 + $0x40] sm:$0xff]  ;;  %v1610_v49 = vld [vmem:[#allocation13 + $0x18] sm:$0xff] }
 0x5cb   : > { %2224 = vmatprep.subr.msk.mxu1 %vm765_vm0, %v1378_v52 }
 0x5cc   : > { %v1372_v54 = vpop.permute.xlu1 %1371 }
 0x5ce   : > { %v1374_v59 = vpop.permute.xlu0 %1373 }
 0x5d6   : > { %v2401_v53 = vpop.eup %2400 }
 0x5d7   : > { %v2403_v55 = vpop.eup %2402  ;;  %2221 = vmatprep.mubr.msk.f32.mxu1 %vm855_vm1, %v2401_v53  ;;  %v1272_v6 = vsel %vm855_vm1, %v2401_v53, 0.0  ;;  %v1608_v53 = vld [vmem:[#allocation13 + $0x8] sm:$0xff] }
 0x5d8   : > { %2222 = vmatmul.mubr.msk.f32.vlgmr.msra.gmra.mxu1 %vm855_vm1, %v2403_v55  ;;  %v1275_v7 = vsel %vm855_vm1, %v2403_v55, 0.0  ;;  %v1607_v55 = vld [vmem:[#allocation13] sm:$0xff] }
 0x5d9   : > { %2225 = vmatpush3.xpose.msk.msra.mxu1 %vm765_vm0, %v1378_v52  ;;  %2228 = vmatprep.mubr.msk.f32.mxu1 %vm765_vm0, %v1372_v54 }
 0x5da   : > { %2226 = vmatprep.subr.msk.mxu1 %vm765_vm0, %v1376_v56 }
 0x5dd   : > { %2227 = vmatpush3.xpose.msk.msra.mxu1 %vm765_vm0, %v1376_v56 }
 0x5e0   : > { %2229 = vmatmul.mubr.msk.f32.vlgmr.msra.gmra.mxu1 %vm765_vm0, %v1374_v59 }
 0x698   : > { %v3147_v60 = vpop.f32.mrf.mxu1 }
 0x69a   : > { %v1360_v61 = vpop.f32.mrf.mxu1 }
 0x6a0   : > { %v2230_v62 = vpop.f32.mrf.mxu1 }
 0x6a1   : > { %v1463_v63 = vmul.f32 0.17677669, %v2230_v62 }
 0x6a2   : > { %v1453_v0 = vpop.f32.mrf.mxu1 }
 0x6a3   : > { %v1462_v1 = vmul.f32 0.17677669, %v1453_v0  ;;  %v1467_v2 = vsel %vm855_vm1, %v1463_v63, -inf }
 0x6a4   : > { %1468 = vmax.xlane.f32.xlu0 %v1467_v2 }
 0x6a5   : > { %v1464_v3 = vsel %vm855_vm1, %v1462_v1, -inf }
 0x6a6   : > { %1465 = vmax.xlane.f32.xlu1 %v1464_v3 }
 0x6b7   : > { %1486 = vrot.lane.b32.xlu1 %v3068_v58, %s2705_s20 }
 0x6ba   : > { %1488 = vrot.lane.b32.xlu0 %v3063_v57, %s2705_s20 }
 0x6d9   : > { %1070 = vadd.xlane.f32.xlu0 %v1069_v4 }
 0x6db   : > { %1067 = vadd.xlane.f32.xlu1 %v1066_v5 }
 0x6dd   : > { %1273 = vadd.xlane.f32.xlu0 %v1272_v6 }
 0x6df   : > { %1276 = vadd.xlane.f32.xlu1 %v1275_v7 }
 0x72d   : > { %v1469_v9 = vpop.xlane.xlu0 %1468 }
 0x72e   : > { %v1471_v11 = vsub.f32 %v1463_v63, %v1469_v9 }
 0x72f   : > { %v1466_v58 = vpop.xlane.xlu1 %1465 }
 0x730   : > { %v1474_v12 = vmul.f32 1.442695, %v1471_v11  ;;  %v1470_v13 = vsub.f32 %v1462_v1, %v1466_v58 }
 0x731   : > { %v1489_v57 = vpop.permute.xlu0 %1488 }
 0x732   : > { %2404 = vpow2.f32 %v1474_v12  ;;  %v1472_v16 = vmul.f32 1.442695, %v1470_v13  ;;  %2231 = vmatprep.subr.mxu1 %v1489_v57 }
 0x733   : > { %2232 = vmatpush3.msra.mxu1 %v1489_v57  ;;  %v1487_v17 = vpop.permute.xlu1 %1486 }
 0x734   : > { %2406 = vpow2.f32 %v1472_v16  ;;  %2233 = vmatprep.subr.mxu1 %v1487_v17 }
 0x735   : > { %2234 = vmatpush3.msra.mxu1 %v1487_v17 }
 0x73f   : > { %v2405_v18 = vpop.eup %2404 }
 0x740   : > { %v1479_v19 = vsel %vm855_vm1, %v2405_v18, 0.0 }
 0x741   : > { %v2407_v20 = vpop.eup %2406  ;;  %1480 = vadd.xlane.f32.xlu1 %v1479_v19 }
 0x742   : > { %2235 = vmatprep.mubr.msk.f32.mxu1 %vm855_vm1, %v2407_v20  ;;  %v1476_v21 = vsel %vm855_vm1, %v2407_v20, 0.0 }
 0x743   : > { %1477 = vadd.xlane.f32.xlu0 %v1476_v21  ;;  %2236 = vmatmul.mubr.msk.f32.vlgmr.msra.gmra.mxu1 %vm855_vm1, %v2405_v18 }
 0x745   : > { %872 = vadd.xlane.f32.xlu1 %v871_v22 }
 0x747   : > { %869 = vadd.xlane.f32.xlu0 %v868_v23  ;;  %v486_v23 = vld [vmem:[%s407_s29] sm:$0xff]  ;;  %s1746_s29 = scalar_lea.sflag [#allocation4], %s2998_s12 }
 0x762   : > { %v1071_v24 = vpop.xlane.xlu0 %1070 }
 0x763   : > { %2408 = vrcp.f32 %v1071_v24 }
 0x764   : > { %v1068_v25 = vpop.xlane.xlu1 %1067 }
 0x765   : > { %2410 = vrcp.f32 %v1068_v25 }
 0x766   : > { %v1274_v26 = vpop.xlane.xlu0 %1273 }
 0x767   : > { %2412 = vrcp.f32 %v1274_v26 }
 0x768   : > { %v1277_v27 = vpop.xlane.xlu1 %1276 }
 0x769   : > { %2414 = vrcp.f32 %v1277_v27 }
 0x770   : > { %v2409_v28 = vpop.eup %2408 }
 0x771   : > { %v1166_v31 = vmul.f32 %v2409_v28, %v3123_v36  ;;  %v1618_v36 = vld [vmem:[#allocation13 + $0x58] sm:$0xff] }
 0x772   : > { %v2411_v29 = vpop.eup %2410 }
 0x773   : > { %v1165_v30 = vmul.f32 %v2411_v29, %v3125_v37  ;;  %v1619_v37 = vld [vmem:[#allocation13 + $0x60] sm:$0xff] }
 0x774   : > { %v2413_v10 = vpop.eup %2412  ;;  %2244 = vmatprep.subr.mxu0 %v1619_v37 }
 0x775   : > { %v2377_v32 = vpack.i.bf16 %v1166_v31, %v1165_v30  ;;  %v1369_v8 = vmul.f32 %v2413_v10, %v1360_v61  ;;  %2245 = vmatpush3.msra.mxu0 %v1619_v37 }
 0x776   : > { %v2415_v33 = vpop.eup %2414  ;;  %2246 = vmatprep.subr.mxu0 %v1618_v36 }
 0x777   : > { %2378 = vrot.lane.b32.xlu0 %v2377_v32, %s2705_s20  ;;  %v1370_v34 = vmul.f32 %v2415_v33, %v3147_v60  ;;  %2247 = vmatpush3.msra.mxu0 %v1618_v36 }
 0x778   : > { %2248 = vmatprep.subr.mxu0 %v1617_v42 }
 0x779   : > { %v2382_v38 = vpack.i.bf16 %v1370_v34, %v1369_v8  ;;  %2249 = vmatpush3.msra.mxu0 %v1617_v42  ;;  %v1962_v42 = vld [vmem:[%s3245_s7] ss:$0 sm:$0xff] }
 0x77a   : > { %2250 = vmatprep.subr.mxu0 %v1616_v43 }
 0x77b   : > { %2383 = vrot.lane.b32.xlu1 %v2382_v38, %s2704_s27  ;;  %2251 = vmatpush3.msra.mxu0 %v1616_v43 }
 0x77c   : > { %2252 = vmatprep.subr.mxu0 %v1615_v44 }
 0x77d   : > { %2253 = vmatpush3.msra.mxu0 %v1615_v44  ;;  %v1963_v44 = vld [vmem:[%s3246_s8] ss:$0 sm:$0xff] }
 0x77e   : > { %2254 = vmatprep.subr.mxu0 %v1614_v45 }
 0x77f   : > { %2255 = vmatpush3.msra.mxu0 %v1614_v45 }
 0x780   : > { %2256 = vmatprep.subr.mxu0 %v1613_v46 }
 0x781   : > { %2257 = vmatpush3.msra.mxu0 %v1613_v46 }
 0x782   : > { %2258 = vmatprep.subr.mxu0 %v1612_v47 }
 0x783   : > { %2259 = vmatpush3.msra.mxu0 %v1612_v47 }
 0x784   : > { %2260 = vmatprep.subr.mxu0 %v1611_v48 }
 0x785   : > { %2261 = vmatpush3.msra.mxu0 %v1611_v48 }
 0x786   : > { %2262 = vmatprep.subr.mxu0 %v1610_v49 }
 0x787   : > { %2263 = vmatpush3.msra.mxu0 %v1610_v49 }
 0x788   : > { %2264 = vmatprep.subr.mxu0 %v1609_v50 }
 0x789   : > { %2265 = vmatpush3.msra.mxu0 %v1609_v50 }
 0x78a   : > { %2266 = vmatprep.subr.mxu0 %v1608_v53 }
 0x78b   : > { %2267 = vmatpush3.msra.mxu0 %v1608_v53 }
 0x78c   : > { %2268 = vmatprep.subr.mxu0 %v1607_v55 }
 0x78d   : > { %2269 = vmatpush3.msra.mxu0 %v1607_v55 }
 0x7ca   : > { %v1481_v51 = vpop.xlane.xlu1 %1480 }
 0x7cb   : > { %2416 = vrcp.f32 %v1481_v51 }
 0x7cc   : > { %v1478_v52 = vpop.xlane.xlu0 %1477 }
 0x7cd   : > { %2418 = vrcp.f32 %v1478_v52 }
 0x7ce   : > { %v873_v0 = vpop.xlane.xlu1 %872 }
 0x7cf   : > { %2420 = vrcp.f32 %v873_v0 }
 0x7d0   : > { %v870_v1 = vpop.xlane.xlu0 %869 }
 0x7d1   : > { %2422 = vrcp.f32 %v870_v1 }
 0x7d8   : > { %v2417_v56 = vpop.eup %2416 }
 0x7da   : > { %v2419_v59 = vpop.eup %2418 }
 0x7dc   : > { %v2421_v3 = vpop.eup %2420 }
 0x7dd   : > { %v960_v58 = vmul.f32 %v2421_v3, %v3095_v14 }
 0x7de   : > { %v2423_v5 = vpop.eup %2422 }
 0x7df   : > { %v959_v12 = vmul.f32 %v2423_v5, %v3097_v15 }
 0x7e9   : > { %v2379_v2 = vpop.permute.xlu0 %2378 }
 0x7ea   : > { %v2381_v6 = vunpack.i.h.bf16 %v2379_v2  ;;  %v2380_v7 = vunpack.i.l.bf16 %v2379_v2 }
 0x7ec   : > { %v1600_v57 = vsel %vm765_vm0, %v960_v58, %v2381_v6  ;;  %v1599_v18 = vsel %vm765_vm0, %v959_v12, %v2380_v7 }
 0x7ed   : > { %v2384_v4 = vpop.permute.xlu1 %2383 }
 0x7ee   : > { %v2386_v9 = vunpack.i.h.bf16 %v2384_v4  ;;  %v2385_v11 = vunpack.i.l.bf16 %v2384_v4 }
 0x7f0   : > { %v1602_v19 = vsel %vm1601_vm2, %v1599_v18, %v2385_v11  ;;  %v1603_v20 = vsel %vm1601_vm2, %v1600_v57, %v2386_v9 }
 0x803   : > { %v2237_v54 = vpop.f32.mrf.mxu1 }
 0x804   : > { %v1574_v61 = vmul.f32 %v2417_v56, %v2237_v54 }
 0x805   : > { %v1564_v60 = vpop.f32.mrf.mxu1 }
 0x806   : > { %v1573_v62 = vmul.f32 %v2419_v59, %v1564_v60 }
 0x808   : > { %v2387_v63 = vpack.i.bf16 %v1574_v61, %v1573_v62 }
 0x80a   : > { %2388 = vrot.lane.b32.xlu1 %v2387_v63, %s2703_s15 }
 0x87c   : > { %v2389_v13 = vpop.permute.xlu1 %2388 }
 0x87d   : > { %v2391_v16 = vunpack.i.h.bf16 %v2389_v13  ;;  %v2390_v17 = vunpack.i.l.bf16 %v2389_v13 }
 0x87f   : > { %v1605_v21 = vsel %vm1604_vm3, %v1602_v19, %v2390_v17  ;;  %v1606_v22 = vsel %vm1604_vm3, %v1603_v20, %v2391_v16 }
 0x880   : > { %2270 = vmatprep.mubr.f32.mxu0 %v1605_v21 }
 0x881   : > { %2271 = vmatmul.mubr.f32.vlgmr.msra.gmra.mxu0 %v1606_v22 }
 0x882   : > { %2109 = vmatprep.mubr.f32.mxu0 %v486_v23 }
 0x941   : > { %v2272_v14 = vpop.f32.mrf.mxu0 }
 0x942   : > { %v1695_v15 = vadd.f32 %v2272_v14, %v3030_v35 }
 0x943   : > { %v1689_v24 = vpop.f32.mrf.mxu0 }
 0x944   : > { %v1690_v25 = vadd.f32 %v1689_v24, %v486_v23  ;;  %1700 = vadd.xlane.f32.xlu1 %v1695_v15  ;;  %v1703_v27 = vmul.f32 %v1695_v15, %v1695_v15 }
 0x946   : > { %1698 = vadd.xlane.f32.xlu0 %v1690_v25  ;;  %v1702_v26 = vmul.f32 %v1690_v25, %v1690_v25 }
 0x94a   : > { %1704 = vadd.xlane.f32.xlu0 %v1702_v26 }
 0x94e   : > { %1706 = vadd.xlane.f32.xlu0 %v1703_v27 }
 0x9cd   : > { %v1701_v30 = vpop.xlane.xlu1 %1700 }
 0x9ce   : > { %v1710_v10 = vmul.f32 0.0078125, %v1701_v30 }
 0x9cf   : > { %v1699_v28 = vpop.xlane.xlu0 %1698 }
 0x9d0   : > { %v1709_v29 = vmul.f32 0.0078125, %v1699_v28  ;;  %v1714_v38 = vmul.f32 %v1710_v10, %v1710_v10  ;;  %v1722_v45 = vsub.f32 %v1695_v15, %v1710_v10 }
 0x9d2   : > { %v1713_v32 = vmul.f32 %v1709_v29, %v1709_v29  ;;  %v1721_v37 = vsub.f32 %v1690_v25, %v1709_v29 }
 0x9d3   : > { %v1705_v31 = vpop.xlane.xlu0 %1704 }
 0x9d4   : > { %v1711_v33 = vmul.f32 0.0078125, %v1705_v31 }
 0x9d6   : > { %v1715_v8 = vsub.f32 %v1711_v33, %v1713_v32 }
 0x9d7   : > { %v1707_v34 = vpop.xlane.xlu0 %1706 }
 0x9d8   : > { %v1717_v39 = vadd.f32 1e-05, %v1715_v8  ;;  %v1712_v35 = vmul.f32 0.0078125, %v1707_v34 }
 0x9da   : > { %2424 = vrsqrt.f32 %v1717_v39  ;;  %v1716_v40 = vsub.f32 %v1712_v35, %v1714_v38 }
 0x9dc   : > { %v1718_v41 = vadd.f32 1e-05, %v1716_v40 }
 0x9de   : > { %2426 = vrsqrt.f32 %v1718_v41 }
 0x9e7   : > { %v2425_v36 = vpop.eup %2424 }
 0x9e8   : > { %v1723_v43 = vmul.f32 %v2425_v36, %v1721_v37 }
 0x9ea   : > { %v1732_v46 = vmul.f32 %v1962_v42, %v1723_v43 }
 0x9eb   : > { %v2427_v47 = vpop.eup %2426 }
 0x9ec   : > { %v1724_v48 = vmul.f32 %v2427_v47, %v1722_v45  ;;  %v1741_v49 = vadd.f32 %v1963_v44, %v1732_v46 }
 0x9ee   : > { %v1733_v50 = vmul.f32 %v1962_v42, %v1724_v48  ;;  %1743 = vst [vmem:[%s485_s22] sm:$0xff] %v1741_v49 }
 0x9f0   : > { %v1742_v51 = vadd.f32 %v1963_v44, %v1733_v50 }
 0x9f2   : > { %1744 = vst [vmem:[%s485_s22 + $0x8] sm:$0xff] %v1742_v51 }
 0x9f3   : > { %2629 = shalt.err (!%p2626_p6)
}
 0x9f4   : > { %s2630_s16 = scalar_lea.hbm %s3193_s25, 256  ;;  %s2634_s27 = scalar_lea.hbm %s3247_s9, 512 }
 0x9f5   : > { %p2631_p13 = scmp.ne.s32.totalorder %s3193_s25, %s2630_s16  ;;  %p2635_p2 = scmp.lt.s32.totalorder %s3193_s25, %s3247_s9 }
 0x9f6   : > { %p2636_p0 = scmp.lt.s32.totalorder %s2634_s27, %s2630_s16 }
 0x9f7   : > { %p2632_p7 = pnand %p2631_p13, %p3295_p5 }
 0x9f8   : > { %p2637_p1 = por %p2636_p0, %p2635_p2 }
 0x9f9   : > { %p2633_p9 = pneg %p2632_p7 }
 0x9fb   : > { %p2638_p12 = pnand %p2637_p1, %p2633_p9 }
 0x9fd   : > { %2641 = shalt.err (!%p2638_p12)
}
 0x9fe   : > { %s2707_s24 = smov 128   ;;  %s2708_s21 = smov 8  }
 0x9ff   : > { %2295 = dma.vmem_to_hbm [thread:$0]  (%p3295_p5), %s3195_s28, 256, %s3193_s25, %s1746_s29, %s2707_s24, %s2707_s24, %s2708_s21  }
 0xa00 PF: > { %s3296_s3 = sld [smem:[#allocation20_spill]] }
 0xa01   : > { %s3297_s14 = sld [smem:[#allocation22_spill]] }
 0xa02   : > { %s3298_s22 = sld [smem:[#allocation21_spill]] }
 0xa06   : > { %s1774_s1 = sand.u32 1, %s3296_s3  }
 0xa07   : > { %p3299_p4 = scmp.ne.s32.totalorder %s3297_s14, 0  ;;  %s1775_s5 = scalar_lea.sflag [#allocation4], %s1774_s1 }
 0xa08   : > { %p3300_p8 = scmp.ge.s32.totalorder %s3298_s22, 2 }
 0xa0a   : > { %p2321_p11 = pnand %p3300_p8, %p3299_p4 }
 0xa0c   : > { %p2322_p10 = pneg %p2321_p11 }
 0xa0e   : > { %2675 = dma.done.wait (%p2322_p10), %s1775_s5, 256  }
 0xa0f   : > { %2677 = vsyncadd (%p2322_p10), %s1775_s5, 4294967040  ;;  %s3301_s12 = sld [smem:[#allocation23_spill]]  ;;  %s3303_s30 = smov %s2684_s10 }
 0xa10   : > { %s3302_s17 = sld [smem:[#allocation24_spill]]  ;;  %s3304_s10 = smov %s2688_s11 }
 0xa15   : > { %p27_p3 = scmp.ge.s32.totalorder %s3301_s12, 4  }
 0xa16   : > { %s3305_s11 = smov %s3302_s17 }
 0xa17   :  { %29 = sbr.rel (!%p27_p3) target bundleno = 13 (0xd), region = 141 }
 0xa1c   :  { %1780 = vsyncpa [#allocation3], 1 }
 0xa1d   :  { %1782 = vsyncpa [#allocation3 + $0x1], 1 }
 0xa1e   :  { %1783 = vsyncpa [#allocation6], 1 }
 0xa1f   :  { %1785 = vsyncpa [#allocation6 + $0x1], 1 }
 0xa20   :  { %1786 = vsyncpa [#allocation9], 1 }
 0xa21   :  { %1787 = vsyncpa [#allocation12], 1 }
 0xa22   :  { %1788 = vsyncpa [#allocation4], 1 }
 0xa23   :  { %1790 = vsyncpa [#allocation4 + $0x1], 1 }

</bundles_post_ra>
